<compile_context>
chip_gen: v7x
topology: tpu7x:2x2x1
jax: 0.10.0
libtpu: 0.0.40
codegen_flags: <defaults>
</compile_context>

<pallas_src>
import jax
import jax.numpy as jnp
from jax import lax
from jax.experimental import pallas as pl
from jax.experimental.pallas import tpu as pltpu


# ----------------------------------------------------------------------------
# numerics shared by kernels and the pure-JAX reference
# ----------------------------------------------------------------------------
def _layernorm(x, g, b, eps=1e-5):
    m = jnp.mean(x, axis=-1, keepdims=True)
    v = jnp.mean((x - m) ** 2, axis=-1, keepdims=True)
    return (x - m) * lax.rsqrt(v + eps) * g + b


def _gelu(x):
    c = 0.7978845608028654  # sqrt(2/pi)
    return 0.5 * x * (1.0 + jnp.tanh(c * (x + 0.044715 * x * x * x)))


def _sigmoid(x):
    return 1.0 / (1.0 + jnp.exp(-x))


def _mm_bf16(a, b):
    # bf16 MXU matmul with f32 accumulation (matches the kernel math).
    return jnp.dot(a.astype(jnp.bfloat16), b.astype(jnp.bfloat16),
                   preferred_element_type=jnp.float32)


# ----------------------------------------------------------------------------
# generation-aware VMEM budgeting
# ----------------------------------------------------------------------------
def _vmem_capacity_bytes():
    try:
        cap = getattr(pltpu.get_tpu_info(), "vmem_capacity_bytes", None)
        if cap:
            return int(cap)
    except Exception:
        pass
    return 128 << 20  # v5e / v6e physical size as a conservative default


def _vmem_limit(nbytes):
    cap = _vmem_capacity_bytes() - (12 << 20)   # headroom for Mosaic scratch
    want = 2 * int(nbytes) + (4 << 20)
    return int(min(max(want, 32 << 20), cap))


# ----------------------------------------------------------------------------
# Pallas kernels
# ----------------------------------------------------------------------------
def _embed_kernel(tok_ref, emb_hbm, o_ref, sem):
    """Chunked embedding gather: R row DMAs in flight per grid step."""
    rows = o_ref.shape[0]
    base = pl.program_id(0) * rows
    copies = []
    for r in range(rows):                       # static unroll; scalar reads first
        copies.append(pltpu.make_async_copy(
            emb_hbm.at[tok_ref[base + r]], o_ref.at[r], sem.at[r]))
    for cp in copies:
        cp.start()
    for cp in copies:
        cp.wait()


def _layers_kernel(x0_hbm, s0_hbm,
                   pool_s_ref, bcast_x_ref, pool_x_ref, bcast_s_ref,
                   gx_ref, bx_ref, gs_ref, bs_ref,
                   wh_ref, wo_ref, wcg_ref,
                   ng_ref, nb_ref, wgauss_ref,
                   xn_out_ref, gauss_out_ref,
                   x_sc, s_sc, init_sem):
    """Grid = (batch_group "parallel", layer "arbitrary").

    Per group the activations (BgT, D) and state (BgS, D) live in VMEM scratch
    for the whole layer sweep.  x0/s0 stay in HBM and are DMA'd in at l == 0.
    Per-batch means are two tiny matmuls (pool then broadcast).  The per-layer
    projections are fused into MXU-256-wide matmuls.
    """
    g = pl.program_id(0)
    l = pl.program_id(1)

    @pl.when(l == 0)
    def _init():
        cx = pltpu.make_async_copy(x0_hbm.at[g], x_sc, init_sem.at[0])
        cs = pltpu.make_async_copy(s0_hbm.at[g], s_sc, init_sem.at[1])
        cx.start()
        cs.start()
        cx.wait()
        cs.wait()

    x = x_sc[...]                                     # (BgT, D) f32
    s = s_sc[...]                                     # (BgS, D) f32
    D = x.shape[-1]

    xn = _layernorm(x, gx_ref[0], bx_ref[0])
    sn = _layernorm(s, gs_ref[0], bs_ref[0])

    # two-stage per-batch mean + row broadcast (tiny, exact, f32)
    s_mean = jnp.dot(pool_s_ref[...], sn, preferred_element_type=jnp.float32)
    s_mean_rows = jnp.dot(bcast_x_ref[...], s_mean,
                          preferred_element_type=jnp.float32)   # (BgT, D)
    x_mean = jnp.dot(pool_x_ref[...], xn, preferred_element_type=jnp.float32)
    x_mean_rows = jnp.dot(bcast_s_ref[...], x_mean,
                          preferred_element_type=jnp.float32)   # (BgS, D)

    # h-branch: one K=2D matmul, then the output projection
    lhs_h = jnp.concatenate([xn, s_mean_rows], axis=-1).astype(jnp.bfloat16)
    h = _gelu(jnp.dot(lhs_h, wh_ref[0], preferred_element_type=jnp.float32))
    x_new = x + jnp.dot(h.astype(jnp.bfloat16), wo_ref[0],
                        preferred_element_type=jnp.float32)

    # cand/gate: one K=2D, N=2D matmul, then lane-aligned split
    lhs_cg = jnp.concatenate([sn, x_mean_rows], axis=-1).astype(jnp.bfloat16)
    cg = jnp.dot(lhs_cg, wcg_ref[0], preferred_element_type=jnp.float32)
    cand = jnp.tanh(cg[:, :D])
    gate = _sigmoid(cg[:, D:])
    s_new = gate * s + (1.0 - gate) * cand

    x_sc[...] = x_new
    s_sc[...] = s_new

    @pl.when(l == pl.num_programs(1) - 1)
    def _finalize():
        # fused final LayerNorm (feeds the logits matmul) + to_gaussian.
        xn_f = _layernorm(x_new, ng_ref[...], nb_ref[...])
        xn_out_ref[...] = xn_f.astype(jnp.bfloat16)
        gauss_out_ref[...] = jnp.dot(s_new.astype(jnp.bfloat16), wgauss_ref[...],
                                     preferred_element_type=jnp.float32)


def _logits_kernel(x_ref, w_ref, o_ref):
    # x is fully resident; one MXU matmul per V tile (no K axis, no scratch).
    o_ref[...] = jnp.dot(x_ref[...], w_ref[...],
                         preferred_element_type=jnp.float32)


# ----------------------------------------------------------------------------
# wrappers around pallas_call
# ----------------------------------------------------------------------------
def embed_pallas(tokens, emb):
    """Embedding lookup as a chunked DMA row gather (ids scalar-prefetched)."""
    B, T = tokens.shape
    V, D = emb.shape
    BT = B * T
    tok = tokens.reshape(BT).astype(jnp.int32)

    rows = next((r for r in (32, 16, 8) if BT % r == 0), None)
    if rows is None:
        # TODO(synk): irregular B*T; fall back to an XLA gather.
        return jnp.take(emb, tok, axis=0)

    grid_spec = pltpu.PrefetchScalarGridSpec(
        num_scalar_prefetch=1,
        grid=(BT // rows,),
        in_specs=[pl.BlockSpec(memory_space=pl.ANY)],        # table stays in HBM
        out_specs=pl.BlockSpec((rows, D), lambda i, ids: (i, 0)),
        scratch_shapes=[pltpu.SemaphoreType.DMA((rows,))],
    )
    out = pl.pallas_call(
        _embed_kernel,
        out_shape=jax.ShapeDtypeStruct((BT, D), jnp.float32),
        grid_spec=grid_spec,
        compiler_params=pltpu.CompilerParams(
            dimension_semantics=("arbitrary",),
            vmem_limit_bytes=_vmem_limit(2 * rows * D * 4)),
        cost_estimate=pl.CostEstimate(flops=0, transcendentals=0,
                                      bytes_accessed=2 * BT * D * 4),
    )(tok, emb)
    return out


def layers_pallas(x0g, s0g, prep):
    G, BgT, D = x0g.shape
    BgS = s0g.shape[1]
    L = prep["w_h"].shape[0]
    Dg = prep["w_gauss_bf16"].shape[1]
    Bp = prep["pool_s"].shape[0]

    def const(shape):
        return pl.BlockSpec(shape, lambda g, l: (0,) * len(shape))

    vec = pl.BlockSpec((1, 1, D), lambda g, l: (l, 0, 0))

    grid_spec = pltpu.PrefetchScalarGridSpec(
        num_scalar_prefetch=0,
        grid=(G, L),
        in_specs=[pl.BlockSpec(memory_space=pl.ANY),       # x0  (G, BgT, D) HBM
                  pl.BlockSpec(memory_space=pl.ANY),       # s0  (G, BgS, D) HBM
                  const((Bp, BgS)), const((BgT, Bp)),
                  const((Bp, BgT)), const((BgS, Bp)),
                  vec, vec, vec, vec,
                  pl.BlockSpec((1, 2 * D, D), lambda g, l: (l, 0, 0)),
                  pl.BlockSpec((1, D, D), lambda g, l: (l, 0, 0)),
                  pl.BlockSpec((1, 2 * D, 2 * D), lambda g, l: (l, 0, 0)),
                  const((1, D)), const((1, D)),
                  const((D, Dg))],
        out_specs=(pl.BlockSpec((BgT, D), lambda g, l: (g, 0)),
                   pl.BlockSpec((BgS, Dg), lambda g, l: (g, 0))),
        scratch_shapes=[pltpu.VMEM((BgT, D), jnp.float32),
                        pltpu.VMEM((BgS, D), jnp.float32),
                        pltpu.SemaphoreType.DMA((2,))],
    )

    # TODO(synk): when 28*D*D bytes (double-buffered fused weights) approaches
    # the chip's VMEM capacity (D >~ 1500 on v7x), add a K/N tiling axis over D.
    est = (2 * (7 * D * D * 2 + 4 * D * 4)            # double-buffered layer weights
           + (BgT + BgS) * D * 4                      # resident activation scratch
           + 2 * (BgT * D * 2 + BgS * Dg * 4)         # double-buffered outputs
           + D * Dg * 2 + 2 * D * 4                   # w_gauss + final norm
           + 4 * Bp * (BgS + BgT) * 4)                # pool/broadcast constants

    flops_step = (2 * BgT * (2 * D) * D + 2 * BgT * D * D
                  + 2 * BgS * (2 * D) * (2 * D)
                  + 4 * Bp * (BgS + BgT) * D)
    cost = pl.CostEstimate(
        flops=G * (L * flops_step + 2 * BgS * D * Dg),
        transcendentals=G * L * (BgT * D + 2 * BgS * D),
        bytes_accessed=(G * L * (7 * D * D + 4 * D) * 2
                        + G * (BgT + BgS) * D * 4
                        + G * (BgT * D * 2 + BgS * Dg * 4)
                        + D * Dg * 2))

    return pl.pallas_call(
        _layers_kernel,
        out_shape=(jax.ShapeDtypeStruct((G * BgT, D), jnp.bfloat16),
                   jax.ShapeDtypeStruct((G * BgS, Dg), jnp.float32)),
        grid_spec=grid_spec,
        compiler_params=pltpu.CompilerParams(
            dimension_semantics=("parallel", "arbitrary"),
            vmem_limit_bytes=_vmem_limit(est)),
        cost_estimate=cost,
    )(x0g, s0g,
      prep["pool_s"], prep["bcast_x"], prep["pool_x"], prep["bcast_s"],
      prep["gx"], prep["bx"], prep["gs"], prep["bs"],
      prep["w_h"], prep["w_o"], prep["w_cg"],
      prep["norm_g"], prep["norm_b"], prep["w_gauss_bf16"])


def logits_pallas(x_bf16, w_bf16, *, tn=256):
    """(M, D) x (D, V) matmul; x fully resident, V tiled 256-wide."""
    M, D = x_bf16.shape
    V = w_bf16.shape[1]
    tn = min(tn, V)
    grid = (pl.cdiv(V, tn),)

    grid_spec = pltpu.PrefetchScalarGridSpec(
        num_scalar_prefetch=0,
        grid=grid,
        in_specs=[pl.BlockSpec((M, D), lambda j: (0, 0)),    # resident across V
                  pl.BlockSpec((D, tn), lambda j: (0, j))],
        out_specs=pl.BlockSpec((M, tn), lambda j: (0, j)),
    )
    cost = pl.CostEstimate(flops=2 * M * D * V, transcendentals=0,
                           bytes_accessed=M * D * 2 + D * V * 2 + M * V * 4)
    est = M * D * 2 + 2 * (D * tn * 2 + M * tn * 4)
    # TODO(synk): fuse this matmul into the last-layer finalize of the layers
    # kernel to drop one pallas_call and the xn HBM round trip.
    return pl.pallas_call(
        _logits_kernel,
        out_shape=jax.ShapeDtypeStruct((M, V), jnp.float32),
        grid_spec=grid_spec,
        compiler_params=pltpu.CompilerParams(
            dimension_semantics=("parallel",),
            vmem_limit_bytes=_vmem_limit(est)),
        cost_estimate=cost,
    )(x_bf16, w_bf16)


# ----------------------------------------------------------------------------
# hoisted, once-per-model parameter preparation
# ----------------------------------------------------------------------------
def prepare_params(params, batch, seq_len, groups=None):
    """Built ONCE (not per forward): fused/stacked bf16 weights + pool consts."""
    D = params["emb"].shape[1]
    S = params["h0"].shape[1]
    layers = params["layers"]
    if groups is None:
        groups = 2 if (batch % 2 == 0 and batch >= 2) else 1  # v7x: 1 group / TC
    Bg = batch // groups
    assert batch % groups == 0
    assert D % 128 == 0 and (Bg * seq_len) % 8 == 0 and (Bg * S) % 8 == 0

    def cat_h(p):    # [wx ; wsx]  -> fused K=2D h-branch weight
        return jnp.concatenate([p["wx"], p["wsx"]], axis=0)

    def cat_cg(p):   # [[ws wg] ; [wxs wxg]] -> fused K=2D, N=2D cand/gate weight
        return jnp.concatenate(
            [jnp.concatenate([p["ws"], p["wg"]], axis=1),
             jnp.concatenate([p["wxs"], p["wxg"]], axis=1)], axis=0)

    prep = {
        "groups": groups,
        "emb": params["emb"],
        "h0": params["h0"],
        "w_h": jnp.stack([cat_h(p) for p in layers]).astype(jnp.bfloat16),
        "w_o": jnp.stack([p["wxo"] for p in layers]).astype(jnp.bfloat16),
        "w_cg": jnp.stack([cat_cg(p) for p in layers]).astype(jnp.bfloat16),
        "gx": jnp.stack([p["gx"] for p in layers])[:, None, :],
        "bx": jnp.stack([p["bx"] for p in layers])[:, None, :],
        "gs": jnp.stack([p["gs"] for p in layers])[:, None, :],
        "bs": jnp.stack([p["bs"] for p in layers])[:, None, :],
        "norm_g": params["norm_g"].reshape(1, D),
        "norm_b": params["norm_b"].reshape(1, D),
        "w_gauss_bf16": params["w_gauss"].astype(jnp.bfloat16),
        "w_logits_bf16": params["w_logits"].astype(jnp.bfloat16),
    }

    # two-stage pool + broadcast constants, zero-padded to a sublane-aligned
    # Bp so every matmul operand has >= 8 rows/cols.
    Bp = max(8, ((Bg + 7) // 8) * 8)
    eye_pad = jnp.zeros((Bp, Bg), jnp.float32).at[:Bg, :].set(
        jnp.eye(Bg, dtype=jnp.float32))
    prep["pool_s"] = jnp.repeat(eye_pad, S, axis=1) / float(S)            # (Bp, BgS)
    prep["pool_x"] = jnp.repeat(eye_pad, seq_len, axis=1) / float(seq_len)  # (Bp, BgT)
    prep["bcast_x"] = jnp.repeat(eye_pad.T, seq_len, axis=0)              # (BgT, Bp)
    prep["bcast_s"] = jnp.repeat(eye_pad.T, S, axis=0)                    # (BgS, Bp)
    return prep


# ----------------------------------------------------------------------------
# full forward pass (Pallas kernels + JAX glue)
# ----------------------------------------------------------------------------
def forward(tokens, prep, eps_key):
    B, T = tokens.shape
    D = prep["emb"].shape[1]
    S = prep["h0"].shape[1]
    V = prep["w_logits_bf16"].shape[1]
    G = prep["groups"]

    # state=None branch; matches the PyTorch source: state = mean + logvar * eps
    h0b = jnp.broadcast_to(prep["h0"], (B, S, 2 * D))
    h0_mean, h0_logvar = h0b[..., :D], h0b[..., D:]
    eps = jax.random.normal(eps_key, h0_mean.shape, dtype=jnp.float32)
    state0 = h0_mean + h0_logvar * eps                         # (B, S, D)

    x0 = embed_pallas(tokens, prep["emb"])                     # (B*T, D) f32
    x0g = x0.reshape(G, (B // G) * T, D)
    s0g = state0.reshape(G, (B // G) * S, D)

    xn_bf16, gauss = layers_pallas(x0g, s0g, prep)
    logits = logits_pallas(xn_bf16, prep["w_logits_bf16"])
    return logits.reshape(B, T, V), gauss.reshape(B, S, 2 * D)


# pure-JAX reference (same math, incl. bf16 matmul operands) for correctness
def forward_ref(tokens, params, eps_key):
    B, T = tokens.shape
    D = params["emb"].shape[1]
    S = params["h0"].shape[1]
    h0b = jnp.broadcast_to(params["h0"], (B, S, 2 * D))
    h0_mean, h0_logvar = h0b[..., :D], h0b[..., D:]
    eps = jax.random.normal(eps_key, h0_mean.shape, dtype=jnp.float32)
    state = h0_mean + h0_logvar * eps

    x = jnp.take(params["emb"], tokens, axis=0)                # (B, T, D)
    for p in params["layers"]:
        xn = _layernorm(x, p["gx"], p["bx"])
        sn = _layernorm(state, p["gs"], p["bs"])
        s_mean = jnp.mean(sn, axis=1)                          # (B, D)
        x_mean = jnp.mean(xn, axis=1)                          # (B, D)
        h = _gelu(_mm_bf16(xn, p["wx"]) + _mm_bf16(s_mean, p["wsx"])[:, None, :])
        x = x + _mm_bf16(h, p["wxo"])
        cand = jnp.tanh(_mm_bf16(sn, p["ws"]) + _mm_bf16(x_mean, p["wxs"])[:, None, :])
        gate = _sigmoid(_mm_bf16(sn, p["wg"]) + _mm_bf16(x_mean, p["wxg"])[:, None, :])
        state = gate * state + (1.0 - gate) * cand
    logits = _mm_bf16(_layernorm(x, params["norm_g"], params["norm_b"]),
                      params["w_logits"])
    state = _mm_bf16(state, params["w_gauss"])
    return logits, state


# ----------------------------------------------------------------------------
# deterministic parameter construction
# ----------------------------------------------------------------------------
def make_params(key, num_tokens, dim, num_layers, state_len):
    keys = jax.random.split(key, 6 + num_layers)
    params = {
        "emb": jax.random.normal(keys[0], (num_tokens, dim), jnp.float32),
        "w_logits": 0.02 * jax.random.normal(keys[1], (dim, num_tokens), jnp.float32),
        "w_gauss": 0.02 * jax.random.normal(keys[2], (dim, 2 * dim), jnp.float32),
        # module inits h0 to zeros; randomize slightly to exercise the state path
        "h0": 0.1 * jax.random.normal(keys[3], (1, state_len, 2 * dim), jnp.float32),
        "norm_g": 1.0 + 0.1 * jax.random.normal(keys[4], (dim,), jnp.float32),
        "norm_b": 0.1 * jax.random.normal(keys[5], (dim,), jnp.float32),
        "layers": [],
    }
    for li in range(num_layers):
        wk = jax.random.split(keys[6 + li], 11)
        layer = {
            "gx": 1.0 + 0.1 * jax.random.normal(wk[7], (dim,), jnp.float32),
            "bx": 0.1 * jax.random.normal(wk[8], (dim,), jnp.float32),
            "gs": 1.0 + 0.1 * jax.random.normal(wk[9], (dim,), jnp.float32),
            "bs": 0.1 * jax.random.normal(wk[10], (dim,), jnp.float32),
        }
        for name, k in zip(["wx", "wsx", "wxo", "ws", "wxs", "wg", "wxg"], wk[:7]):
            layer[name] = 0.02 * jax.random.normal(k, (dim, dim), jnp.float32)
        params["layers"].append(layer)
    return params


if __name__ == "__main__":
    # small, lane/sublane-aligned shapes (D, V multiples of 128; T, S of 8)
    B, T = 2, 8            # batch, sequence length (token ids)
    DIM = 128              # model dim
    NUM_TOKENS = 256       # vocab
    STATE_LEN = 8          # config.state_len
    NUM_LAYERS = 2         # config.num_layers

    root = jax.random.PRNGKey(0)
    k_params, k_tok, k_eps = jax.random.split(root, 3)

    params = make_params(k_params, NUM_TOKENS, DIM, NUM_LAYERS, STATE_LEN)
    tokens = jax.random.randint(k_tok, (B, T), 0, NUM_TOKENS, dtype=jnp.int32)

    # hoisted once-per-model prep (bf16 weight fusion, pooling constants, ...)
    prep = prepare_params(params, B, T)

    logits, state_out = forward(tokens, prep, k_eps)
    logits = jax.block_until_ready(logits)
    state_out = jax.block_until_ready(state_out)

    assert logits.shape == (B, T, NUM_TOKENS)
    assert state_out.shape == (B, STATE_LEN, 2 * DIM)

    ref_logits, ref_state = forward_ref(tokens, params, k_eps)
    assert jnp.allclose(logits, ref_logits, atol=2e-2, rtol=2e-2), "logits mismatch"
    assert jnp.allclose(state_out, ref_state, atol=2e-2, rtol=2e-2), "state mismatch"

    print("KERNEL_OK")
</pallas_src>

<mosaic_0001>
module attributes {stable_mosaic.version = 11 : i64} {
  func.func @_embed_kernel(%arg0: i32, %arg1: memref<16xi32, #tpu.memory_space<smem>>, %arg2: memref<256x128xf32, #tpu.memory_space<any>>, %arg3: memref<16x128xf32, #tpu.memory_space<vmem>>, %arg4: memref<16x!tpu.dma_semaphore, #tpu.memory_space<semaphore_mem>>) attributes {dimension_semantics = [#tpu.dimension_semantics<arbitrary>], iteration_bounds = array<i64: 1>, scalar_prefetch = 1 : i64, scratch_operands = 1 : i64, tpu.core_type = #tpu.core_type<tc>, window_params = [{}, {transform_indices = @transform_1, window_bounds = array<i64: 16, 128>}]} {
    %c16_i32 = arith.constant 16 : i32
    %0 = arith.muli %arg0, %c16_i32 : i32
    %c0_i32 = arith.constant 0 : i32
    %1 = arith.addi %0, %c0_i32 : i32
    %2 = arith.index_cast %1 : i32 to index
    %3 = memref.load %arg1[%2] : memref<16xi32, #tpu.memory_space<smem>>
    %c1_i32 = arith.constant 1 : i32
    %4 = arith.addi %0, %c1_i32 : i32
    %5 = arith.index_cast %4 : i32 to index
    %6 = memref.load %arg1[%5] : memref<16xi32, #tpu.memory_space<smem>>
    %c2_i32 = arith.constant 2 : i32
    %7 = arith.addi %0, %c2_i32 : i32
    %8 = arith.index_cast %7 : i32 to index
    %9 = memref.load %arg1[%8] : memref<16xi32, #tpu.memory_space<smem>>
    %c3_i32 = arith.constant 3 : i32
    %10 = arith.addi %0, %c3_i32 : i32
    %11 = arith.index_cast %10 : i32 to index
    %12 = memref.load %arg1[%11] : memref<16xi32, #tpu.memory_space<smem>>
    %c4_i32 = arith.constant 4 : i32
    %13 = arith.addi %0, %c4_i32 : i32
    %14 = arith.index_cast %13 : i32 to index
    %15 = memref.load %arg1[%14] : memref<16xi32, #tpu.memory_space<smem>>
    %c5_i32 = arith.constant 5 : i32
    %16 = arith.addi %0, %c5_i32 : i32
    %17 = arith.index_cast %16 : i32 to index
    %18 = memref.load %arg1[%17] : memref<16xi32, #tpu.memory_space<smem>>
    %c6_i32 = arith.constant 6 : i32
    %19 = arith.addi %0, %c6_i32 : i32
    %20 = arith.index_cast %19 : i32 to index
    %21 = memref.load %arg1[%20] : memref<16xi32, #tpu.memory_space<smem>>
    %c7_i32 = arith.constant 7 : i32
    %22 = arith.addi %0, %c7_i32 : i32
    %23 = arith.index_cast %22 : i32 to index
    %24 = memref.load %arg1[%23] : memref<16xi32, #tpu.memory_space<smem>>
    %c8_i32 = arith.constant 8 : i32
    %25 = arith.addi %0, %c8_i32 : i32
    %26 = arith.index_cast %25 : i32 to index
    %27 = memref.load %arg1[%26] : memref<16xi32, #tpu.memory_space<smem>>
    %c9_i32 = arith.constant 9 : i32
    %28 = arith.addi %0, %c9_i32 : i32
    %29 = arith.index_cast %28 : i32 to index
    %30 = memref.load %arg1[%29] : memref<16xi32, #tpu.memory_space<smem>>
    %c10_i32 = arith.constant 10 : i32
    %31 = arith.addi %0, %c10_i32 : i32
    %32 = arith.index_cast %31 : i32 to index
    %33 = memref.load %arg1[%32] : memref<16xi32, #tpu.memory_space<smem>>
    %c11_i32 = arith.constant 11 : i32
    %34 = arith.addi %0, %c11_i32 : i32
    %35 = arith.index_cast %34 : i32 to index
    %36 = memref.load %arg1[%35] : memref<16xi32, #tpu.memory_space<smem>>
    %c12_i32 = arith.constant 12 : i32
    %37 = arith.addi %0, %c12_i32 : i32
    %38 = arith.index_cast %37 : i32 to index
    %39 = memref.load %arg1[%38] : memref<16xi32, #tpu.memory_space<smem>>
    %c13_i32 = arith.constant 13 : i32
    %40 = arith.addi %0, %c13_i32 : i32
    %41 = arith.index_cast %40 : i32 to index
    %42 = memref.load %arg1[%41] : memref<16xi32, #tpu.memory_space<smem>>
    %c14_i32 = arith.constant 14 : i32
    %43 = arith.addi %0, %c14_i32 : i32
    %44 = arith.index_cast %43 : i32 to index
    %45 = memref.load %arg1[%44] : memref<16xi32, #tpu.memory_space<smem>>
    %c15_i32 = arith.constant 15 : i32
    %46 = arith.addi %0, %c15_i32 : i32
    %47 = arith.index_cast %46 : i32 to index
    %48 = memref.load %arg1[%47] : memref<16xi32, #tpu.memory_space<smem>>
    %c0_i32_0 = arith.constant 0 : i32
    %c0_i32_1 = arith.constant 0 : i32
    %c0_i32_2 = arith.constant 0 : i32
    %49 = tpu.memref_slice %arg2[%3, %c0_i32_2] : memref<256x128xf32, #tpu.memory_space<any>> -> memref<1x128xf32, #tpu.memory_space<any>>
    %50 = tpu.memref_squeeze %49 : memref<1x128xf32, #tpu.memory_space<any>> -> memref<128xf32, #tpu.memory_space<any>>
    %c0_i32_3 = arith.constant 0 : i32
    %51 = tpu.memref_slice %arg3[%c0_i32_0, %c0_i32_3] : memref<16x128xf32, #tpu.memory_space<vmem>> -> memref<1x128xf32, #tpu.memory_space<vmem>>
    %52 = tpu.memref_squeeze %51 : memref<1x128xf32, #tpu.memory_space<vmem>> -> memref<128xf32, #tpu.memory_space<vmem>>
    %53 = tpu.memref_slice %arg4[%c0_i32_1] : memref<16x!tpu.dma_semaphore, #tpu.memory_space<semaphore_mem>> -> memref<1x!tpu.dma_semaphore, #tpu.memory_space<semaphore_mem>>
    %54 = tpu.memref_squeeze %53 : memref<1x!tpu.dma_semaphore, #tpu.memory_space<semaphore_mem>> -> memref<!tpu.dma_semaphore, #tpu.memory_space<semaphore_mem>>
    tpu.enqueue_dma source(%50 : memref<128xf32, #tpu.memory_space<any>>) target(%52 : memref<128xf32, #tpu.memory_space<vmem>>) target_semaphore(%54 : memref<!tpu.dma_semaphore, #tpu.memory_space<semaphore_mem>>)
    %c1_i32_4 = arith.constant 1 : i32
    %c1_i32_5 = arith.constant 1 : i32
    %c0_i32_6 = arith.constant 0 : i32
    %55 = tpu.memref_slice %arg2[%6, %c0_i32_6] : memref<256x128xf32, #tpu.memory_space<any>> -> memref<1x128xf32, #tpu.memory_space<any>>
    %56 = tpu.memref_squeeze %55 : memref<1x128xf32, #tpu.memory_space<any>> -> memref<128xf32, #tpu.memory_space<any>>
    %c0_i32_7 = arith.constant 0 : i32
    %57 = tpu.memref_slice %arg3[%c1_i32_4, %c0_i32_7] : memref<16x128xf32, #tpu.memory_space<vmem>> -> memref<1x128xf32, #tpu.memory_space<vmem>>
    %58 = tpu.memref_squeeze %57 : memref<1x128xf32, #tpu.memory_space<vmem>> -> memref<128xf32, #tpu.memory_space<vmem>>
    %59 = tpu.memref_slice %arg4[%c1_i32_5] : memref<16x!tpu.dma_semaphore, #tpu.memory_space<semaphore_mem>> -> memref<1x!tpu.dma_semaphore, #tpu.memory_space<semaphore_mem>>
    %60 = tpu.memref_squeeze %59 : memref<1x!tpu.dma_semaphore, #tpu.memory_space<semaphore_mem>> -> memref<!tpu.dma_semaphore, #tpu.memory_space<semaphore_mem>>
    tpu.enqueue_dma source(%56 : memref<128xf32, #tpu.memory_space<any>>) target(%58 : memref<128xf32, #tpu.memory_space<vmem>>) target_semaphore(%60 : memref<!tpu.dma_semaphore, #tpu.memory_space<semaphore_mem>>)
    %c2_i32_8 = arith.constant 2 : i32
    %c2_i32_9 = arith.constant 2 : i32
    %c0_i32_10 = arith.constant 0 : i32
    %61 = tpu.memref_slice %arg2[%9, %c0_i32_10] : memref<256x128xf32, #tpu.memory_space<any>> -> memref<1x128xf32, #tpu.memory_space<any>>
    %62 = tpu.memref_squeeze %61 : memref<1x128xf32, #tpu.memory_space<any>> -> memref<128xf32, #tpu.memory_space<any>>
    %c0_i32_11 = arith.constant 0 : i32
    %63 = tpu.memref_slice %arg3[%c2_i32_8, %c0_i32_11] : memref<16x128xf32, #tpu.memory_space<vmem>> -> memref<1x128xf32, #tpu.memory_space<vmem>>
    %64 = tpu.memref_squeeze %63 : memref<1x128xf32, #tpu.memory_space<vmem>> -> memref<128xf32, #tpu.memory_space<vmem>>
    %65 = tpu.memref_slice %arg4[%c2_i32_9] : memref<16x!tpu.dma_semaphore, #tpu.memory_space<semaphore_mem>> -> memref<1x!tpu.dma_semaphore, #tpu.memory_space<semaphore_mem>>
    %66 = tpu.memref_squeeze %65 : memref<1x!tpu.dma_semaphore, #tpu.memory_space<semaphore_mem>> -> memref<!tpu.dma_semaphore, #tpu.memory_space<semaphore_mem>>
    tpu.enqueue_dma source(%62 : memref<128xf32, #tpu.memory_space<any>>) target(%64 : memref<128xf32, #tpu.memory_space<vmem>>) target_semaphore(%66 : memref<!tpu.dma_semaphore, #tpu.memory_space<semaphore_mem>>)
    %c3_i32_12 = arith.constant 3 : i32
    %c3_i32_13 = arith.constant 3 : i32
    %c0_i32_14 = arith.constant 0 : i32
    %67 = tpu.memref_slice %arg2[%12, %c0_i32_14] : memref<256x128xf32, #tpu.memory_space<any>> -> memref<1x128xf32, #tpu.memory_space<any>>
    %68 = tpu.memref_squeeze %67 : memref<1x128xf32, #tpu.memory_space<any>> -> memref<128xf32, #tpu.memory_space<any>>
    %c0_i32_15 = arith.constant 0 : i32
    %69 = tpu.memref_slice %arg3[%c3_i32_12, %c0_i32_15] : memref<16x128xf32, #tpu.memory_space<vmem>> -> memref<1x128xf32, #tpu.memory_space<vmem>>
    %70 = tpu.memref_squeeze %69 : memref<1x128xf32, #tpu.memory_space<vmem>> -> memref<128xf32, #tpu.memory_space<vmem>>
    %71 = tpu.memref_slice %arg4[%c3_i32_13] : memref<16x!tpu.dma_semaphore, #tpu.memory_space<semaphore_mem>> -> memref<1x!tpu.dma_semaphore, #tpu.memory_space<semaphore_mem>>
    %72 = tpu.memref_squeeze %71 : memref<1x!tpu.dma_semaphore, #tpu.memory_space<semaphore_mem>> -> memref<!tpu.dma_semaphore, #tpu.memory_space<semaphore_mem>>
    tpu.enqueue_dma source(%68 : memref<128xf32, #tpu.memory_space<any>>) target(%70 : memref<128xf32, #tpu.memory_space<vmem>>) target_semaphore(%72 : memref<!tpu.dma_semaphore, #tpu.memory_space<semaphore_mem>>)
    %c4_i32_16 = arith.constant 4 : i32
    %c4_i32_17 = arith.constant 4 : i32
    %c0_i32_18 = arith.constant 0 : i32
    %73 = tpu.memref_slice %arg2[%15, %c0_i32_18] : memref<256x128xf32, #tpu.memory_space<any>> -> memref<1x128xf32, #tpu.memory_space<any>>
    %74 = tpu.memref_squeeze %73 : memref<1x128xf32, #tpu.memory_space<any>> -> memref<128xf32, #tpu.memory_space<any>>
    %c0_i32_19 = arith.constant 0 : i32
    %75 = tpu.memref_slice %arg3[%c4_i32_16, %c0_i32_19] : memref<16x128xf32, #tpu.memory_space<vmem>> -> memref<1x128xf32, #tpu.memory_space<vmem>>
    %76 = tpu.memref_squeeze %75 : memref<1x128xf32, #tpu.memory_space<vmem>> -> memref<128xf32, #tpu.memory_space<vmem>>
    %77 = tpu.memref_slice %arg4[%c4_i32_17] : memref<16x!tpu.dma_semaphore, #tpu.memory_space<semaphore_mem>> -> memref<1x!tpu.dma_semaphore, #tpu.memory_space<semaphore_mem>>
    %78 = tpu.memref_squeeze %77 : memref<1x!tpu.dma_semaphore, #tpu.memory_space<semaphore_mem>> -> memref<!tpu.dma_semaphore, #tpu.memory_space<semaphore_mem>>
    tpu.enqueue_dma source(%74 : memref<128xf32, #tpu.memory_space<any>>) target(%76 : memref<128xf32, #tpu.memory_space<vmem>>) target_semaphore(%78 : memref<!tpu.dma_semaphore, #tpu.memory_space<semaphore_mem>>)
    %c5_i32_20 = arith.constant 5 : i32
    %c5_i32_21 = arith.constant 5 : i32
    %c0_i32_22 = arith.constant 0 : i32
    %79 = tpu.memref_slice %arg2[%18, %c0_i32_22] : memref<256x128xf32, #tpu.memory_space<any>> -> memref<1x128xf32, #tpu.memory_space<any>>
    %80 = tpu.memref_squeeze %79 : memref<1x128xf32, #tpu.memory_space<any>> -> memref<128xf32, #tpu.memory_space<any>>
    %c0_i32_23 = arith.constant 0 : i32
    %81 = tpu.memref_slice %arg3[%c5_i32_20, %c0_i32_23] : memref<16x128xf32, #tpu.memory_space<vmem>> -> memref<1x128xf32, #tpu.memory_space<vmem>>
    %82 = tpu.memref_squeeze %81 : memref<1x128xf32, #tpu.memory_space<vmem>> -> memref<128xf32, #tpu.memory_space<vmem>>
    %83 = tpu.memref_slice %arg4[%c5_i32_21] : memref<16x!tpu.dma_semaphore, #tpu.memory_space<semaphore_mem>> -> memref<1x!tpu.dma_semaphore, #tpu.memory_space<semaphore_mem>>
    %84 = tpu.memref_squeeze %83 : memref<1x!tpu.dma_semaphore, #tpu.memory_space<semaphore_mem>> -> memref<!tpu.dma_semaphore, #tpu.memory_space<semaphore_mem>>
    tpu.enqueue_dma source(%80 : memref<128xf32, #tpu.memory_space<any>>) target(%82 : memref<128xf32, #tpu.memory_space<vmem>>) target_semaphore(%84 : memref<!tpu.dma_semaphore, #tpu.memory_space<semaphore_mem>>)
    %c6_i32_24 = arith.constant 6 : i32
    %c6_i32_25 = arith.constant 6 : i32
    %c0_i32_26 = arith.constant 0 : i32
    %85 = tpu.memref_slice %arg2[%21, %c0_i32_26] : memref<256x128xf32, #tpu.memory_space<any>> -> memref<1x128xf32, #tpu.memory_space<any>>
    %86 = tpu.memref_squeeze %85 : memref<1x128xf32, #tpu.memory_space<any>> -> memref<128xf32, #tpu.memory_space<any>>
    %c0_i32_27 = arith.constant 0 : i32
    %87 = tpu.memref_slice %arg3[%c6_i32_24, %c0_i32_27] : memref<16x128xf32, #tpu.memory_space<vmem>> -> memref<1x128xf32, #tpu.memory_space<vmem>>
    %88 = tpu.memref_squeeze %87 : memref<1x128xf32, #tpu.memory_space<vmem>> -> memref<128xf32, #tpu.memory_space<vmem>>
    %89 = tpu.memref_slice %arg4[%c6_i32_25] : memref<16x!tpu.dma_semaphore, #tpu.memory_space<semaphore_mem>> -> memref<1x!tpu.dma_semaphore, #tpu.memory_space<semaphore_mem>>
    %90 = tpu.memref_squeeze %89 : memref<1x!tpu.dma_semaphore, #tpu.memory_space<semaphore_mem>> -> memref<!tpu.dma_semaphore, #tpu.memory_space<semaphore_mem>>
    tpu.enqueue_dma source(%86 : memref<128xf32, #tpu.memory_space<any>>) target(%88 : memref<128xf32, #tpu.memory_space<vmem>>) target_semaphore(%90 : memref<!tpu.dma_semaphore, #tpu.memory_space<semaphore_mem>>)
    %c7_i32_28 = arith.constant 7 : i32
    %c7_i32_29 = arith.constant 7 : i32
    %c0_i32_30 = arith.constant 0 : i32
    %91 = tpu.memref_slice %arg2[%24, %c0_i32_30] : memref<256x128xf32, #tpu.memory_space<any>> -> memref<1x128xf32, #tpu.memory_space<any>>
    %92 = tpu.memref_squeeze %91 : memref<1x128xf32, #tpu.memory_space<any>> -> memref<128xf32, #tpu.memory_space<any>>
    %c0_i32_31 = arith.constant 0 : i32
    %93 = tpu.memref_slice %arg3[%c7_i32_28, %c0_i32_31] : memref<16x128xf32, #tpu.memory_space<vmem>> -> memref<1x128xf32, #tpu.memory_space<vmem>>
    %94 = tpu.memref_squeeze %93 : memref<1x128xf32, #tpu.memory_space<vmem>> -> memref<128xf32, #tpu.memory_space<vmem>>
    %95 = tpu.memref_slice %arg4[%c7_i32_29] : memref<16x!tpu.dma_semaphore, #tpu.memory_space<semaphore_mem>> -> memref<1x!tpu.dma_semaphore, #tpu.memory_space<semaphore_mem>>
    %96 = tpu.memref_squeeze %95 : memref<1x!tpu.dma_semaphore, #tpu.memory_space<semaphore_mem>> -> memref<!tpu.dma_semaphore, #tpu.memory_space<semaphore_mem>>
    tpu.enqueue_dma source(%92 : memref<128xf32, #tpu.memory_space<any>>) target(%94 : memref<128xf32, #tpu.memory_space<vmem>>) target_semaphore(%96 : memref<!tpu.dma_semaphore, #tpu.memory_space<semaphore_mem>>)
    %c8_i32_32 = arith.constant 8 : i32
    %c8_i32_33 = arith.constant 8 : i32
    %c0_i32_34 = arith.constant 0 : i32
    %97 = tpu.memref_slice %arg2[%27, %c0_i32_34] : memref<256x128xf32, #tpu.memory_space<any>> -> memref<1x128xf32, #tpu.memory_space<any>>
    %98 = tpu.memref_squeeze %97 : memref<1x128xf32, #tpu.memory_space<any>> -> memref<128xf32, #tpu.memory_space<any>>
    %c0_i32_35 = arith.constant 0 : i32
    %99 = tpu.memref_slice %arg3[%c8_i32_32, %c0_i32_35] : memref<16x128xf32, #tpu.memory_space<vmem>> -> memref<1x128xf32, #tpu.memory_space<vmem>>
    %100 = tpu.memref_squeeze %99 : memref<1x128xf32, #tpu.memory_space<vmem>> -> memref<128xf32, #tpu.memory_space<vmem>>
    %101 = tpu.memref_slice %arg4[%c8_i32_33] : memref<16x!tpu.dma_semaphore, #tpu.memory_space<semaphore_mem>> -> memref<1x!tpu.dma_semaphore, #tpu.memory_space<semaphore_mem>>
    %102 = tpu.memref_squeeze %101 : memref<1x!tpu.dma_semaphore, #tpu.memory_space<semaphore_mem>> -> memref<!tpu.dma_semaphore, #tpu.memory_space<semaphore_mem>>
    tpu.enqueue_dma source(%98 : memref<128xf32, #tpu.memory_space<any>>) target(%100 : memref<128xf32, #tpu.memory_space<vmem>>) target_semaphore(%102 : memref<!tpu.dma_semaphore, #tpu.memory_space<semaphore_mem>>)
    %c9_i32_36 = arith.constant 9 : i32
    %c9_i32_37 = arith.constant 9 : i32
    %c0_i32_38 = arith.constant 0 : i32
    %103 = tpu.memref_slice %arg2[%30, %c0_i32_38] : memref<256x128xf32, #tpu.memory_space<any>> -> memref<1x128xf32, #tpu.memory_space<any>>
    %104 = tpu.memref_squeeze %103 : memref<1x128xf32, #tpu.memory_space<any>> -> memref<128xf32, #tpu.memory_space<any>>
    %c0_i32_39 = arith.constant 0 : i32
    %105 = tpu.memref_slice %arg3[%c9_i32_36, %c0_i32_39] : memref<16x128xf32, #tpu.memory_space<vmem>> -> memref<1x128xf32, #tpu.memory_space<vmem>>
    %106 = tpu.memref_squeeze %105 : memref<1x128xf32, #tpu.memory_space<vmem>> -> memref<128xf32, #tpu.memory_space<vmem>>
    %107 = tpu.memref_slice %arg4[%c9_i32_37] : memref<16x!tpu.dma_semaphore, #tpu.memory_space<semaphore_mem>> -> memref<1x!tpu.dma_semaphore, #tpu.memory_space<semaphore_mem>>
    %108 = tpu.memref_squeeze %107 : memref<1x!tpu.dma_semaphore, #tpu.memory_space<semaphore_mem>> -> memref<!tpu.dma_semaphore, #tpu.memory_space<semaphore_mem>>
    tpu.enqueue_dma source(%104 : memref<128xf32, #tpu.memory_space<any>>) target(%106 : memref<128xf32, #tpu.memory_space<vmem>>) target_semaphore(%108 : memref<!tpu.dma_semaphore, #tpu.memory_space<semaphore_mem>>)
    %c10_i32_40 = arith.constant 10 : i32
    %c10_i32_41 = arith.constant 10 : i32
    %c0_i32_42 = arith.constant 0 : i32
    %109 = tpu.memref_slice %arg2[%33, %c0_i32_42] : memref<256x128xf32, #tpu.memory_space<any>> -> memref<1x128xf32, #tpu.memory_space<any>>
    %110 = tpu.memref_squeeze %109 : memref<1x128xf32, #tpu.memory_space<any>> -> memref<128xf32, #tpu.memory_space<any>>
    %c0_i32_43 = arith.constant 0 : i32
    %111 = tpu.memref_slice %arg3[%c10_i32_40, %c0_i32_43] : memref<16x128xf32, #tpu.memory_space<vmem>> -> memref<1x128xf32, #tpu.memory_space<vmem>>
    %112 = tpu.memref_squeeze %111 : memref<1x128xf32, #tpu.memory_space<vmem>> -> memref<128xf32, #tpu.memory_space<vmem>>
    %113 = tpu.memref_slice %arg4[%c10_i32_41] : memref<16x!tpu.dma_semaphore, #tpu.memory_space<semaphore_mem>> -> memref<1x!tpu.dma_semaphore, #tpu.memory_space<semaphore_mem>>
    %114 = tpu.memref_squeeze %113 : memref<1x!tpu.dma_semaphore, #tpu.memory_space<semaphore_mem>> -> memref<!tpu.dma_semaphore, #tpu.memory_space<semaphore_mem>>
    tpu.enqueue_dma source(%110 : memref<128xf32, #tpu.memory_space<any>>) target(%112 : memref<128xf32, #tpu.memory_space<vmem>>) target_semaphore(%114 : memref<!tpu.dma_semaphore, #tpu.memory_space<semaphore_mem>>)
    %c11_i32_44 = arith.constant 11 : i32
    %c11_i32_45 = arith.constant 11 : i32
    %c0_i32_46 = arith.constant 0 : i32
    %115 = tpu.memref_slice %arg2[%36, %c0_i32_46] : memref<256x128xf32, #tpu.memory_space<any>> -> memref<1x128xf32, #tpu.memory_space<any>>
    %116 = tpu.memref_squeeze %115 : memref<1x128xf32, #tpu.memory_space<any>> -> memref<128xf32, #tpu.memory_space<any>>
    %c0_i32_47 = arith.constant 0 : i32
    %117 = tpu.memref_slice %arg3[%c11_i32_44, %c0_i32_47] : memref<16x128xf32, #tpu.memory_space<vmem>> -> memref<1x128xf32, #tpu.memory_space<vmem>>
    %118 = tpu.memref_squeeze %117 : memref<1x128xf32, #tpu.memory_space<vmem>> -> memref<128xf32, #tpu.memory_space<vmem>>
    %119 = tpu.memref_slice %arg4[%c11_i32_45] : memref<16x!tpu.dma_semaphore, #tpu.memory_space<semaphore_mem>> -> memref<1x!tpu.dma_semaphore, #tpu.memory_space<semaphore_mem>>
    %120 = tpu.memref_squeeze %119 : memref<1x!tpu.dma_semaphore, #tpu.memory_space<semaphore_mem>> -> memref<!tpu.dma_semaphore, #tpu.memory_space<semaphore_mem>>
    tpu.enqueue_dma source(%116 : memref<128xf32, #tpu.memory_space<any>>) target(%118 : memref<128xf32, #tpu.memory_space<vmem>>) target_semaphore(%120 : memref<!tpu.dma_semaphore, #tpu.memory_space<semaphore_mem>>)
    %c12_i32_48 = arith.constant 12 : i32
    %c12_i32_49 = arith.constant 12 : i32
    %c0_i32_50 = arith.constant 0 : i32
    %121 = tpu.memref_slice %arg2[%39, %c0_i32_50] : memref<256x128xf32, #tpu.memory_space<any>> -> memref<1x128xf32, #tpu.memory_space<any>>
    %122 = tpu.memref_squeeze %121 : memref<1x128xf32, #tpu.memory_space<any>> -> memref<128xf32, #tpu.memory_space<any>>
    %c0_i32_51 = arith.constant 0 : i32
    %123 = tpu.memref_slice %arg3[%c12_i32_48, %c0_i32_51] : memref<16x128xf32, #tpu.memory_space<vmem>> -> memref<1x128xf32, #tpu.memory_space<vmem>>
    %124 = tpu.memref_squeeze %123 : memref<1x128xf32, #tpu.memory_space<vmem>> -> memref<128xf32, #tpu.memory_space<vmem>>
    %125 = tpu.memref_slice %arg4[%c12_i32_49] : memref<16x!tpu.dma_semaphore, #tpu.memory_space<semaphore_mem>> -> memref<1x!tpu.dma_semaphore, #tpu.memory_space<semaphore_mem>>
    %126 = tpu.memref_squeeze %125 : memref<1x!tpu.dma_semaphore, #tpu.memory_space<semaphore_mem>> -> memref<!tpu.dma_semaphore, #tpu.memory_space<semaphore_mem>>
    tpu.enqueue_dma source(%122 : memref<128xf32, #tpu.memory_space<any>>) target(%124 : memref<128xf32, #tpu.memory_space<vmem>>) target_semaphore(%126 : memref<!tpu.dma_semaphore, #tpu.memory_space<semaphore_mem>>)
    %c13_i32_52 = arith.constant 13 : i32
    %c13_i32_53 = arith.constant 13 : i32
    %c0_i32_54 = arith.constant 0 : i32
    %127 = tpu.memref_slice %arg2[%42, %c0_i32_54] : memref<256x128xf32, #tpu.memory_space<any>> -> memref<1x128xf32, #tpu.memory_space<any>>
    %128 = tpu.memref_squeeze %127 : memref<1x128xf32, #tpu.memory_space<any>> -> memref<128xf32, #tpu.memory_space<any>>
    %c0_i32_55 = arith.constant 0 : i32
    %129 = tpu.memref_slice %arg3[%c13_i32_52, %c0_i32_55] : memref<16x128xf32, #tpu.memory_space<vmem>> -> memref<1x128xf32, #tpu.memory_space<vmem>>
    %130 = tpu.memref_squeeze %129 : memref<1x128xf32, #tpu.memory_space<vmem>> -> memref<128xf32, #tpu.memory_space<vmem>>
    %131 = tpu.memref_slice %arg4[%c13_i32_53] : memref<16x!tpu.dma_semaphore, #tpu.memory_space<semaphore_mem>> -> memref<1x!tpu.dma_semaphore, #tpu.memory_space<semaphore_mem>>
    %132 = tpu.memref_squeeze %131 : memref<1x!tpu.dma_semaphore, #tpu.memory_space<semaphore_mem>> -> memref<!tpu.dma_semaphore, #tpu.memory_space<semaphore_mem>>
    tpu.enqueue_dma source(%128 : memref<128xf32, #tpu.memory_space<any>>) target(%130 : memref<128xf32, #tpu.memory_space<vmem>>) target_semaphore(%132 : memref<!tpu.dma_semaphore, #tpu.memory_space<semaphore_mem>>)
    %c14_i32_56 = arith.constant 14 : i32
    %c14_i32_57 = arith.constant 14 : i32
    %c0_i32_58 = arith.constant 0 : i32
    %133 = tpu.memref_slice %arg2[%45, %c0_i32_58] : memref<256x128xf32, #tpu.memory_space<any>> -> memref<1x128xf32, #tpu.memory_space<any>>
    %134 = tpu.memref_squeeze %133 : memref<1x128xf32, #tpu.memory_space<any>> -> memref<128xf32, #tpu.memory_space<any>>
    %c0_i32_59 = arith.constant 0 : i32
    %135 = tpu.memref_slice %arg3[%c14_i32_56, %c0_i32_59] : memref<16x128xf32, #tpu.memory_space<vmem>> -> memref<1x128xf32, #tpu.memory_space<vmem>>
    %136 = tpu.memref_squeeze %135 : memref<1x128xf32, #tpu.memory_space<vmem>> -> memref<128xf32, #tpu.memory_space<vmem>>
    %137 = tpu.memref_slice %arg4[%c14_i32_57] : memref<16x!tpu.dma_semaphore, #tpu.memory_space<semaphore_mem>> -> memref<1x!tpu.dma_semaphore, #tpu.memory_space<semaphore_mem>>
    %138 = tpu.memref_squeeze %137 : memref<1x!tpu.dma_semaphore, #tpu.memory_space<semaphore_mem>> -> memref<!tpu.dma_semaphore, #tpu.memory_space<semaphore_mem>>
    tpu.enqueue_dma source(%134 : memref<128xf32, #tpu.memory_space<any>>) target(%136 : memref<128xf32, #tpu.memory_space<vmem>>) target_semaphore(%138 : memref<!tpu.dma_semaphore, #tpu.memory_space<semaphore_mem>>)
    %c15_i32_60 = arith.constant 15 : i32
    %c15_i32_61 = arith.constant 15 : i32
    %c0_i32_62 = arith.constant 0 : i32
    %139 = tpu.memref_slice %arg2[%48, %c0_i32_62] : memref<256x128xf32, #tpu.memory_space<any>> -> memref<1x128xf32, #tpu.memory_space<any>>
    %140 = tpu.memref_squeeze %139 : memref<1x128xf32, #tpu.memory_space<any>> -> memref<128xf32, #tpu.memory_space<any>>
    %c0_i32_63 = arith.constant 0 : i32
    %141 = tpu.memref_slice %arg3[%c15_i32_60, %c0_i32_63] : memref<16x128xf32, #tpu.memory_space<vmem>> -> memref<1x128xf32, #tpu.memory_space<vmem>>
    %142 = tpu.memref_squeeze %141 : memref<1x128xf32, #tpu.memory_space<vmem>> -> memref<128xf32, #tpu.memory_space<vmem>>
    %143 = tpu.memref_slice %arg4[%c15_i32_61] : memref<16x!tpu.dma_semaphore, #tpu.memory_space<semaphore_mem>> -> memref<1x!tpu.dma_semaphore, #tpu.memory_space<semaphore_mem>>
    %144 = tpu.memref_squeeze %143 : memref<1x!tpu.dma_semaphore, #tpu.memory_space<semaphore_mem>> -> memref<!tpu.dma_semaphore, #tpu.memory_space<semaphore_mem>>
    tpu.enqueue_dma source(%140 : memref<128xf32, #tpu.memory_space<any>>) target(%142 : memref<128xf32, #tpu.memory_space<vmem>>) target_semaphore(%144 : memref<!tpu.dma_semaphore, #tpu.memory_space<semaphore_mem>>)
    %c0_i32_64 = arith.constant 0 : i32
    %c0_i32_65 = arith.constant 0 : i32
    %c0_i32_66 = arith.constant 0 : i32
    %145 = tpu.memref_slice %arg2[%3, %c0_i32_66] : memref<256x128xf32, #tpu.memory_space<any>> -> memref<1x128xf32, #tpu.memory_space<any>>
    %146 = tpu.memref_squeeze %145 : memref<1x128xf32, #tpu.memory_space<any>> -> memref<128xf32, #tpu.memory_space<any>>
    %c0_i32_67 = arith.constant 0 : i32
    %147 = tpu.memref_slice %arg3[%c0_i32_64, %c0_i32_67] : memref<16x128xf32, #tpu.memory_space<vmem>> -> memref<1x128xf32, #tpu.memory_space<vmem>>
    %148 = tpu.memref_squeeze %147 : memref<1x128xf32, #tpu.memory_space<vmem>> -> memref<128xf32, #tpu.memory_space<vmem>>
    %149 = tpu.memref_slice %arg4[%c0_i32_65] : memref<16x!tpu.dma_semaphore, #tpu.memory_space<semaphore_mem>> -> memref<1x!tpu.dma_semaphore, #tpu.memory_space<semaphore_mem>>
    %150 = tpu.memref_squeeze %149 : memref<1x!tpu.dma_semaphore, #tpu.memory_space<semaphore_mem>> -> memref<!tpu.dma_semaphore, #tpu.memory_space<semaphore_mem>>
    tpu.wait_dma2 semaphore(%150 : memref<!tpu.dma_semaphore, #tpu.memory_space<semaphore_mem>>) src(%146 : memref<128xf32, #tpu.memory_space<any>>) dst(%148 : memref<128xf32, #tpu.memory_space<vmem>>)
    %c1_i32_68 = arith.constant 1 : i32
    %c1_i32_69 = arith.constant 1 : i32
    %c0_i32_70 = arith.constant 0 : i32
    %151 = tpu.memref_slice %arg2[%6, %c0_i32_70] : memref<256x128xf32, #tpu.memory_space<any>> -> memref<1x128xf32, #tpu.memory_space<any>>
    %152 = tpu.memref_squeeze %151 : memref<1x128xf32, #tpu.memory_space<any>> -> memref<128xf32, #tpu.memory_space<any>>
    %c0_i32_71 = arith.constant 0 : i32
    %153 = tpu.memref_slice %arg3[%c1_i32_68, %c0_i32_71] : memref<16x128xf32, #tpu.memory_space<vmem>> -> memref<1x128xf32, #tpu.memory_space<vmem>>
    %154 = tpu.memref_squeeze %153 : memref<1x128xf32, #tpu.memory_space<vmem>> -> memref<128xf32, #tpu.memory_space<vmem>>
    %155 = tpu.memref_slice %arg4[%c1_i32_69] : memref<16x!tpu.dma_semaphore, #tpu.memory_space<semaphore_mem>> -> memref<1x!tpu.dma_semaphore, #tpu.memory_space<semaphore_mem>>
    %156 = tpu.memref_squeeze %155 : memref<1x!tpu.dma_semaphore, #tpu.memory_space<semaphore_mem>> -> memref<!tpu.dma_semaphore, #tpu.memory_space<semaphore_mem>>
    tpu.wait_dma2 semaphore(%156 : memref<!tpu.dma_semaphore, #tpu.memory_space<semaphore_mem>>) src(%152 : memref<128xf32, #tpu.memory_space<any>>) dst(%154 : memref<128xf32, #tpu.memory_space<vmem>>)
    %c2_i32_72 = arith.constant 2 : i32
    %c2_i32_73 = arith.constant 2 : i32
    %c0_i32_74 = arith.constant 0 : i32
    %157 = tpu.memref_slice %arg2[%9, %c0_i32_74] : memref<256x128xf32, #tpu.memory_space<any>> -> memref<1x128xf32, #tpu.memory_space<any>>
    %158 = tpu.memref_squeeze %157 : memref<1x128xf32, #tpu.memory_space<any>> -> memref<128xf32, #tpu.memory_space<any>>
    %c0_i32_75 = arith.constant 0 : i32
    %159 = tpu.memref_slice %arg3[%c2_i32_72, %c0_i32_75] : memref<16x128xf32, #tpu.memory_space<vmem>> -> memref<1x128xf32, #tpu.memory_space<vmem>>
    %160 = tpu.memref_squeeze %159 : memref<1x128xf32, #tpu.memory_space<vmem>> -> memref<128xf32, #tpu.memory_space<vmem>>
    %161 = tpu.memref_slice %arg4[%c2_i32_73] : memref<16x!tpu.dma_semaphore, #tpu.memory_space<semaphore_mem>> -> memref<1x!tpu.dma_semaphore, #tpu.memory_space<semaphore_mem>>
    %162 = tpu.memref_squeeze %161 : memref<1x!tpu.dma_semaphore, #tpu.memory_space<semaphore_mem>> -> memref<!tpu.dma_semaphore, #tpu.memory_space<semaphore_mem>>
    tpu.wait_dma2 semaphore(%162 : memref<!tpu.dma_semaphore, #tpu.memory_space<semaphore_mem>>) src(%158 : memref<128xf32, #tpu.memory_space<any>>) dst(%160 : memref<128xf32, #tpu.memory_space<vmem>>)
    %c3_i32_76 = arith.constant 3 : i32
    %c3_i32_77 = arith.constant 3 : i32
    %c0_i32_78 = arith.constant 0 : i32
    %163 = tpu.memref_slice %arg2[%12, %c0_i32_78] : memref<256x128xf32, #tpu.memory_space<any>> -> memref<1x128xf32, #tpu.memory_space<any>>
    %164 = tpu.memref_squeeze %163 : memref<1x128xf32, #tpu.memory_space<any>> -> memref<128xf32, #tpu.memory_space<any>>
    %c0_i32_79 = arith.constant 0 : i32
    %165 = tpu.memref_slice %arg3[%c3_i32_76, %c0_i32_79] : memref<16x128xf32, #tpu.memory_space<vmem>> -> memref<1x128xf32, #tpu.memory_space<vmem>>
    %166 = tpu.memref_squeeze %165 : memref<1x128xf32, #tpu.memory_space<vmem>> -> memref<128xf32, #tpu.memory_space<vmem>>
    %167 = tpu.memref_slice %arg4[%c3_i32_77] : memref<16x!tpu.dma_semaphore, #tpu.memory_space<semaphore_mem>> -> memref<1x!tpu.dma_semaphore, #tpu.memory_space<semaphore_mem>>
    %168 = tpu.memref_squeeze %167 : memref<1x!tpu.dma_semaphore, #tpu.memory_space<semaphore_mem>> -> memref<!tpu.dma_semaphore, #tpu.memory_space<semaphore_mem>>
    tpu.wait_dma2 semaphore(%168 : memref<!tpu.dma_semaphore, #tpu.memory_space<semaphore_mem>>) src(%164 : memref<128xf32, #tpu.memory_space<any>>) dst(%166 : memref<128xf32, #tpu.memory_space<vmem>>)
    %c4_i32_80 = arith.constant 4 : i32
    %c4_i32_81 = arith.constant 4 : i32
    %c0_i32_82 = arith.constant 0 : i32
    %169 = tpu.memref_slice %arg2[%15, %c0_i32_82] : memref<256x128xf32, #tpu.memory_space<any>> -> memref<1x128xf32, #tpu.memory_space<any>>
    %170 = tpu.memref_squeeze %169 : memref<1x128xf32, #tpu.memory_space<any>> -> memref<128xf32, #tpu.memory_space<any>>
    %c0_i32_83 = arith.constant 0 : i32
    %171 = tpu.memref_slice %arg3[%c4_i32_80, %c0_i32_83] : memref<16x128xf32, #tpu.memory_space<vmem>> -> memref<1x128xf32, #tpu.memory_space<vmem>>
    %172 = tpu.memref_squeeze %171 : memref<1x128xf32, #tpu.memory_space<vmem>> -> memref<128xf32, #tpu.memory_space<vmem>>
    %173 = tpu.memref_slice %arg4[%c4_i32_81] : memref<16x!tpu.dma_semaphore, #tpu.memory_space<semaphore_mem>> -> memref<1x!tpu.dma_semaphore, #tpu.memory_space<semaphore_mem>>
    %174 = tpu.memref_squeeze %173 : memref<1x!tpu.dma_semaphore, #tpu.memory_space<semaphore_mem>> -> memref<!tpu.dma_semaphore, #tpu.memory_space<semaphore_mem>>
    tpu.wait_dma2 semaphore(%174 : memref<!tpu.dma_semaphore, #tpu.memory_space<semaphore_mem>>) src(%170 : memref<128xf32, #tpu.memory_space<any>>) dst(%172 : memref<128xf32, #tpu.memory_space<vmem>>)
    %c5_i32_84 = arith.constant 5 : i32
    %c5_i32_85 = arith.constant 5 : i32
    %c0_i32_86 = arith.constant 0 : i32
    %175 = tpu.memref_slice %arg2[%18, %c0_i32_86] : memref<256x128xf32, #tpu.memory_space<any>> -> memref<1x128xf32, #tpu.memory_space<any>>
    %176 = tpu.memref_squeeze %175 : memref<1x128xf32, #tpu.memory_space<any>> -> memref<128xf32, #tpu.memory_space<any>>
    %c0_i32_87 = arith.constant 0 : i32
    %177 = tpu.memref_slice %arg3[%c5_i32_84, %c0_i32_87] : memref<16x128xf32, #tpu.memory_space<vmem>> -> memref<1x128xf32, #tpu.memory_space<vmem>>
    %178 = tpu.memref_squeeze %177 : memref<1x128xf32, #tpu.memory_space<vmem>> -> memref<128xf32, #tpu.memory_space<vmem>>
    %179 = tpu.memref_slice %arg4[%c5_i32_85] : memref<16x!tpu.dma_semaphore, #tpu.memory_space<semaphore_mem>> -> memref<1x!tpu.dma_semaphore, #tpu.memory_space<semaphore_mem>>
    %180 = tpu.memref_squeeze %179 : memref<1x!tpu.dma_semaphore, #tpu.memory_space<semaphore_mem>> -> memref<!tpu.dma_semaphore, #tpu.memory_space<semaphore_mem>>
    tpu.wait_dma2 semaphore(%180 : memref<!tpu.dma_semaphore, #tpu.memory_space<semaphore_mem>>) src(%176 : memref<128xf32, #tpu.memory_space<any>>) dst(%178 : memref<128xf32, #tpu.memory_space<vmem>>)
    %c6_i32_88 = arith.constant 6 : i32
    %c6_i32_89 = arith.constant 6 : i32
    %c0_i32_90 = arith.constant 0 : i32
    %181 = tpu.memref_slice %arg2[%21, %c0_i32_90] : memref<256x128xf32, #tpu.memory_space<any>> -> memref<1x128xf32, #tpu.memory_space<any>>
    %182 = tpu.memref_squeeze %181 : memref<1x128xf32, #tpu.memory_space<any>> -> memref<128xf32, #tpu.memory_space<any>>
    %c0_i32_91 = arith.constant 0 : i32
    %183 = tpu.memref_slice %arg3[%c6_i32_88, %c0_i32_91] : memref<16x128xf32, #tpu.memory_space<vmem>> -> memref<1x128xf32, #tpu.memory_space<vmem>>
    %184 = tpu.memref_squeeze %183 : memref<1x128xf32, #tpu.memory_space<vmem>> -> memref<128xf32, #tpu.memory_space<vmem>>
    %185 = tpu.memref_slice %arg4[%c6_i32_89] : memref<16x!tpu.dma_semaphore, #tpu.memory_space<semaphore_mem>> -> memref<1x!tpu.dma_semaphore, #tpu.memory_space<semaphore_mem>>
    %186 = tpu.memref_squeeze %185 : memref<1x!tpu.dma_semaphore, #tpu.memory_space<semaphore_mem>> -> memref<!tpu.dma_semaphore, #tpu.memory_space<semaphore_mem>>
    tpu.wait_dma2 semaphore(%186 : memref<!tpu.dma_semaphore, #tpu.memory_space<semaphore_mem>>) src(%182 : memref<128xf32, #tpu.memory_space<any>>) dst(%184 : memref<128xf32, #tpu.memory_space<vmem>>)
    %c7_i32_92 = arith.constant 7 : i32
    %c7_i32_93 = arith.constant 7 : i32
    %c0_i32_94 = arith.constant 0 : i32
    %187 = tpu.memref_slice %arg2[%24, %c0_i32_94] : memref<256x128xf32, #tpu.memory_space<any>> -> memref<1x128xf32, #tpu.memory_space<any>>
    %188 = tpu.memref_squeeze %187 : memref<1x128xf32, #tpu.memory_space<any>> -> memref<128xf32, #tpu.memory_space<any>>
    %c0_i32_95 = arith.constant 0 : i32
    %189 = tpu.memref_slice %arg3[%c7_i32_92, %c0_i32_95] : memref<16x128xf32, #tpu.memory_space<vmem>> -> memref<1x128xf32, #tpu.memory_space<vmem>>
    %190 = tpu.memref_squeeze %189 : memref<1x128xf32, #tpu.memory_space<vmem>> -> memref<128xf32, #tpu.memory_space<vmem>>
    %191 = tpu.memref_slice %arg4[%c7_i32_93] : memref<16x!tpu.dma_semaphore, #tpu.memory_space<semaphore_mem>> -> memref<1x!tpu.dma_semaphore, #tpu.memory_space<semaphore_mem>>
    %192 = tpu.memref_squeeze %191 : memref<1x!tpu.dma_semaphore, #tpu.memory_space<semaphore_mem>> -> memref<!tpu.dma_semaphore, #tpu.memory_space<semaphore_mem>>
    tpu.wait_dma2 semaphore(%192 : memref<!tpu.dma_semaphore, #tpu.memory_space<semaphore_mem>>) src(%188 : memref<128xf32, #tpu.memory_space<any>>) dst(%190 : memref<128xf32, #tpu.memory_space<vmem>>)
    %c8_i32_96 = arith.constant 8 : i32
    %c8_i32_97 = arith.constant 8 : i32
    %c0_i32_98 = arith.constant 0 : i32
    %193 = tpu.memref_slice %arg2[%27, %c0_i32_98] : memref<256x128xf32, #tpu.memory_space<any>> -> memref<1x128xf32, #tpu.memory_space<any>>
    %194 = tpu.memref_squeeze %193 : memref<1x128xf32, #tpu.memory_space<any>> -> memref<128xf32, #tpu.memory_space<any>>
    %c0_i32_99 = arith.constant 0 : i32
    %195 = tpu.memref_slice %arg3[%c8_i32_96, %c0_i32_99] : memref<16x128xf32, #tpu.memory_space<vmem>> -> memref<1x128xf32, #tpu.memory_space<vmem>>
    %196 = tpu.memref_squeeze %195 : memref<1x128xf32, #tpu.memory_space<vmem>> -> memref<128xf32, #tpu.memory_space<vmem>>
    %197 = tpu.memref_slice %arg4[%c8_i32_97] : memref<16x!tpu.dma_semaphore, #tpu.memory_space<semaphore_mem>> -> memref<1x!tpu.dma_semaphore, #tpu.memory_space<semaphore_mem>>
    %198 = tpu.memref_squeeze %197 : memref<1x!tpu.dma_semaphore, #tpu.memory_space<semaphore_mem>> -> memref<!tpu.dma_semaphore, #tpu.memory_space<semaphore_mem>>
    tpu.wait_dma2 semaphore(%198 : memref<!tpu.dma_semaphore, #tpu.memory_space<semaphore_mem>>) src(%194 : memref<128xf32, #tpu.memory_space<any>>) dst(%196 : memref<128xf32, #tpu.memory_space<vmem>>)
    %c9_i32_100 = arith.constant 9 : i32
    %c9_i32_101 = arith.constant 9 : i32
    %c0_i32_102 = arith.constant 0 : i32
    %199 = tpu.memref_slice %arg2[%30, %c0_i32_102] : memref<256x128xf32, #tpu.memory_space<any>> -> memref<1x128xf32, #tpu.memory_space<any>>
    %200 = tpu.memref_squeeze %199 : memref<1x128xf32, #tpu.memory_space<any>> -> memref<128xf32, #tpu.memory_space<any>>
    %c0_i32_103 = arith.constant 0 : i32
    %201 = tpu.memref_slice %arg3[%c9_i32_100, %c0_i32_103] : memref<16x128xf32, #tpu.memory_space<vmem>> -> memref<1x128xf32, #tpu.memory_space<vmem>>
    %202 = tpu.memref_squeeze %201 : memref<1x128xf32, #tpu.memory_space<vmem>> -> memref<128xf32, #tpu.memory_space<vmem>>
    %203 = tpu.memref_slice %arg4[%c9_i32_101] : memref<16x!tpu.dma_semaphore, #tpu.memory_space<semaphore_mem>> -> memref<1x!tpu.dma_semaphore, #tpu.memory_space<semaphore_mem>>
    %204 = tpu.memref_squeeze %203 : memref<1x!tpu.dma_semaphore, #tpu.memory_space<semaphore_mem>> -> memref<!tpu.dma_semaphore, #tpu.memory_space<semaphore_mem>>
    tpu.wait_dma2 semaphore(%204 : memref<!tpu.dma_semaphore, #tpu.memory_space<semaphore_mem>>) src(%200 : memref<128xf32, #tpu.memory_space<any>>) dst(%202 : memref<128xf32, #tpu.memory_space<vmem>>)
    %c10_i32_104 = arith.constant 10 : i32
    %c10_i32_105 = arith.constant 10 : i32
    %c0_i32_106 = arith.constant 0 : i32
    %205 = tpu.memref_slice %arg2[%33, %c0_i32_106] : memref<256x128xf32, #tpu.memory_space<any>> -> memref<1x128xf32, #tpu.memory_space<any>>
    %206 = tpu.memref_squeeze %205 : memref<1x128xf32, #tpu.memory_space<any>> -> memref<128xf32, #tpu.memory_space<any>>
    %c0_i32_107 = arith.constant 0 : i32
    %207 = tpu.memref_slice %arg3[%c10_i32_104, %c0_i32_107] : memref<16x128xf32, #tpu.memory_space<vmem>> -> memref<1x128xf32, #tpu.memory_space<vmem>>
    %208 = tpu.memref_squeeze %207 : memref<1x128xf32, #tpu.memory_space<vmem>> -> memref<128xf32, #tpu.memory_space<vmem>>
    %209 = tpu.memref_slice %arg4[%c10_i32_105] : memref<16x!tpu.dma_semaphore, #tpu.memory_space<semaphore_mem>> -> memref<1x!tpu.dma_semaphore, #tpu.memory_space<semaphore_mem>>
    %210 = tpu.memref_squeeze %209 : memref<1x!tpu.dma_semaphore, #tpu.memory_space<semaphore_mem>> -> memref<!tpu.dma_semaphore, #tpu.memory_space<semaphore_mem>>
    tpu.wait_dma2 semaphore(%210 : memref<!tpu.dma_semaphore, #tpu.memory_space<semaphore_mem>>) src(%206 : memref<128xf32, #tpu.memory_space<any>>) dst(%208 : memref<128xf32, #tpu.memory_space<vmem>>)
    %c11_i32_108 = arith.constant 11 : i32
    %c11_i32_109 = arith.constant 11 : i32
    %c0_i32_110 = arith.constant 0 : i32
    %211 = tpu.memref_slice %arg2[%36, %c0_i32_110] : memref<256x128xf32, #tpu.memory_space<any>> -> memref<1x128xf32, #tpu.memory_space<any>>
    %212 = tpu.memref_squeeze %211 : memref<1x128xf32, #tpu.memory_space<any>> -> memref<128xf32, #tpu.memory_space<any>>
    %c0_i32_111 = arith.constant 0 : i32
    %213 = tpu.memref_slice %arg3[%c11_i32_108, %c0_i32_111] : memref<16x128xf32, #tpu.memory_space<vmem>> -> memref<1x128xf32, #tpu.memory_space<vmem>>
    %214 = tpu.memref_squeeze %213 : memref<1x128xf32, #tpu.memory_space<vmem>> -> memref<128xf32, #tpu.memory_space<vmem>>
    %215 = tpu.memref_slice %arg4[%c11_i32_109] : memref<16x!tpu.dma_semaphore, #tpu.memory_space<semaphore_mem>> -> memref<1x!tpu.dma_semaphore, #tpu.memory_space<semaphore_mem>>
    %216 = tpu.memref_squeeze %215 : memref<1x!tpu.dma_semaphore, #tpu.memory_space<semaphore_mem>> -> memref<!tpu.dma_semaphore, #tpu.memory_space<semaphore_mem>>
    tpu.wait_dma2 semaphore(%216 : memref<!tpu.dma_semaphore, #tpu.memory_space<semaphore_mem>>) src(%212 : memref<128xf32, #tpu.memory_space<any>>) dst(%214 : memref<128xf32, #tpu.memory_space<vmem>>)
    %c12_i32_112 = arith.constant 12 : i32
    %c12_i32_113 = arith.constant 12 : i32
    %c0_i32_114 = arith.constant 0 : i32
    %217 = tpu.memref_slice %arg2[%39, %c0_i32_114] : memref<256x128xf32, #tpu.memory_space<any>> -> memref<1x128xf32, #tpu.memory_space<any>>
    %218 = tpu.memref_squeeze %217 : memref<1x128xf32, #tpu.memory_space<any>> -> memref<128xf32, #tpu.memory_space<any>>
    %c0_i32_115 = arith.constant 0 : i32
    %219 = tpu.memref_slice %arg3[%c12_i32_112, %c0_i32_115] : memref<16x128xf32, #tpu.memory_space<vmem>> -> memref<1x128xf32, #tpu.memory_space<vmem>>
    %220 = tpu.memref_squeeze %219 : memref<1x128xf32, #tpu.memory_space<vmem>> -> memref<128xf32, #tpu.memory_space<vmem>>
    %221 = tpu.memref_slice %arg4[%c12_i32_113] : memref<16x!tpu.dma_semaphore, #tpu.memory_space<semaphore_mem>> -> memref<1x!tpu.dma_semaphore, #tpu.memory_space<semaphore_mem>>
    %222 = tpu.memref_squeeze %221 : memref<1x!tpu.dma_semaphore, #tpu.memory_space<semaphore_mem>> -> memref<!tpu.dma_semaphore, #tpu.memory_space<semaphore_mem>>
    tpu.wait_dma2 semaphore(%222 : memref<!tpu.dma_semaphore, #tpu.memory_space<semaphore_mem>>) src(%218 : memref<128xf32, #tpu.memory_space<any>>) dst(%220 : memref<128xf32, #tpu.memory_space<vmem>>)
    %c13_i32_116 = arith.constant 13 : i32
    %c13_i32_117 = arith.constant 13 : i32
    %c0_i32_118 = arith.constant 0 : i32
    %223 = tpu.memref_slice %arg2[%42, %c0_i32_118] : memref<256x128xf32, #tpu.memory_space<any>> -> memref<1x128xf32, #tpu.memory_space<any>>
    %224 = tpu.memref_squeeze %223 : memref<1x128xf32, #tpu.memory_space<any>> -> memref<128xf32, #tpu.memory_space<any>>
    %c0_i32_119 = arith.constant 0 : i32
    %225 = tpu.memref_slice %arg3[%c13_i32_116, %c0_i32_119] : memref<16x128xf32, #tpu.memory_space<vmem>> -> memref<1x128xf32, #tpu.memory_space<vmem>>
    %226 = tpu.memref_squeeze %225 : memref<1x128xf32, #tpu.memory_space<vmem>> -> memref<128xf32, #tpu.memory_space<vmem>>
    %227 = tpu.memref_slice %arg4[%c13_i32_117] : memref<16x!tpu.dma_semaphore, #tpu.memory_space<semaphore_mem>> -> memref<1x!tpu.dma_semaphore, #tpu.memory_space<semaphore_mem>>
    %228 = tpu.memref_squeeze %227 : memref<1x!tpu.dma_semaphore, #tpu.memory_space<semaphore_mem>> -> memref<!tpu.dma_semaphore, #tpu.memory_space<semaphore_mem>>
    tpu.wait_dma2 semaphore(%228 : memref<!tpu.dma_semaphore, #tpu.memory_space<semaphore_mem>>) src(%224 : memref<128xf32, #tpu.memory_space<any>>) dst(%226 : memref<128xf32, #tpu.memory_space<vmem>>)
    %c14_i32_120 = arith.constant 14 : i32
    %c14_i32_121 = arith.constant 14 : i32
    %c0_i32_122 = arith.constant 0 : i32
    %229 = tpu.memref_slice %arg2[%45, %c0_i32_122] : memref<256x128xf32, #tpu.memory_space<any>> -> memref<1x128xf32, #tpu.memory_space<any>>
    %230 = tpu.memref_squeeze %229 : memref<1x128xf32, #tpu.memory_space<any>> -> memref<128xf32, #tpu.memory_space<any>>
    %c0_i32_123 = arith.constant 0 : i32
    %231 = tpu.memref_slice %arg3[%c14_i32_120, %c0_i32_123] : memref<16x128xf32, #tpu.memory_space<vmem>> -> memref<1x128xf32, #tpu.memory_space<vmem>>
    %232 = tpu.memref_squeeze %231 : memref<1x128xf32, #tpu.memory_space<vmem>> -> memref<128xf32, #tpu.memory_space<vmem>>
    %233 = tpu.memref_slice %arg4[%c14_i32_121] : memref<16x!tpu.dma_semaphore, #tpu.memory_space<semaphore_mem>> -> memref<1x!tpu.dma_semaphore, #tpu.memory_space<semaphore_mem>>
    %234 = tpu.memref_squeeze %233 : memref<1x!tpu.dma_semaphore, #tpu.memory_space<semaphore_mem>> -> memref<!tpu.dma_semaphore, #tpu.memory_space<semaphore_mem>>
    tpu.wait_dma2 semaphore(%234 : memref<!tpu.dma_semaphore, #tpu.memory_space<semaphore_mem>>) src(%230 : memref<128xf32, #tpu.memory_space<any>>) dst(%232 : memref<128xf32, #tpu.memory_space<vmem>>)
    %c15_i32_124 = arith.constant 15 : i32
    %c15_i32_125 = arith.constant 15 : i32
    %c0_i32_126 = arith.constant 0 : i32
    %235 = tpu.memref_slice %arg2[%48, %c0_i32_126] : memref<256x128xf32, #tpu.memory_space<any>> -> memref<1x128xf32, #tpu.memory_space<any>>
    %236 = tpu.memref_squeeze %235 : memref<1x128xf32, #tpu.memory_space<any>> -> memref<128xf32, #tpu.memory_space<any>>
    %c0_i32_127 = arith.constant 0 : i32
    %237 = tpu.memref_slice %arg3[%c15_i32_124, %c0_i32_127] : memref<16x128xf32, #tpu.memory_space<vmem>> -> memref<1x128xf32, #tpu.memory_space<vmem>>
    %238 = tpu.memref_squeeze %237 : memref<1x128xf32, #tpu.memory_space<vmem>> -> memref<128xf32, #tpu.memory_space<vmem>>
    %239 = tpu.memref_slice %arg4[%c15_i32_125] : memref<16x!tpu.dma_semaphore, #tpu.memory_space<semaphore_mem>> -> memref<1x!tpu.dma_semaphore, #tpu.memory_space<semaphore_mem>>
    %240 = tpu.memref_squeeze %239 : memref<1x!tpu.dma_semaphore, #tpu.memory_space<semaphore_mem>> -> memref<!tpu.dma_semaphore, #tpu.memory_space<semaphore_mem>>
    tpu.wait_dma2 semaphore(%240 : memref<!tpu.dma_semaphore, #tpu.memory_space<semaphore_mem>>) src(%236 : memref<128xf32, #tpu.memory_space<any>>) dst(%238 : memref<128xf32, #tpu.memory_space<vmem>>)
    return
  }
  func.func @transform_1(%arg0: i32, %arg1: memref<16xi32, #tpu.memory_space<smem>>) -> (i32, i32) {
    %c0_i32 = arith.constant 0 : i32
    %c0_i32_0 = arith.constant 0 : i32
    return %arg0, %c0_i32 : i32, i32
  }
}

</mosaic_0001>

<bundles_post_ra>
// kernel: tpu_custom_call.1
= control target key start
LH: loop header
LB: loop body
LE: loop exit
PB: predicated region body
PF: predicated region fallthrough
CT: control target
= control target key end

     0   :  { %s1323_s0 = inlined_call_operand.hbm [shape: s32[16], index: 0, kind: input, shape index: {}]   ;;  %s1324_s1 = inlined_call_operand.hbm [shape: f32[256,128], index: 1, kind: input, shape index: {}]   ;;  %s1325_s2 = inlined_call_operand.hbm [shape: f32[16,128], index: 2, kind: output, shape index: {}]  }
   0x1   :  { %s539_s11 = scalar_lea.hbm %s1323_s0, 16 }
   0x2   :  { %p540_p0 = scmp.ne.s32.totalorder %s1323_s0, %s539_s11  ;;  %p543_p1 = scmp.lt.u32.totalorder %s539_s11, %s1323_s0 }
   0x4   :  { %p545_p2 = pnand %p543_p1, %p540_p0 }
   0x6   :  { %548 = shalt.err (!%p545_p2)  }
   0x7   :  { %s991_s16 = smov [#allocation4]  }
   0x8   :  { %8 = dma.hbm_to_smem %s1323_s0, 16, %s991_s16, [#allocation3] }
   0x9   :  { %955 = dma.done.wait [#allocation3], 16 }
   0xa   :  { %956 = vsyncadd [#allocation3], 4294967280 }
   0xb   :  { %10 = sfence }
   0xc   :  { %11 = vsyncpa [#allocation6], 0  ;;  %s13_s19 = sld [smem:[#allocation4]]  ;;  %s992_s20 = smov [#allocation5]  }
   0xd   :  { %s53_s21 = sshll.u32 %s992_s20, 4  ;;  %s1037_s22 = sld [smem:[#allocation4 + $0x1]]  ;;  %s1039_s21 = int_to_ptr.vmem [resolvable:$true] %s53_s21 }
   0xe   :  { %s993_s23 = smov [#allocation5 + $0x1]   ;;  %s1041_s25 = sld [smem:[#allocation4 + $0x2]] }
   0xf   :  { %s68_s24 = sshll.u32 %s993_s23, 4  ;;  %s994_s26 = smov [#allocation5 + $0x2]   ;;  %s1043_s24 = int_to_ptr.vmem [resolvable:$true] %s68_s24 }
  0x10   :  { %s83_s0 = sshll.u32 %s994_s26, 4  ;;  %s1045_s27 = sld [smem:[#allocation4 + $0x3]]  ;;  %s1047_s0 = int_to_ptr.vmem [resolvable:$true] %s83_s0 }
  0x11   :  { %s1056_s8 = scalar_lea.hbm %s1324_s1, 4096 }
  0x12   :  { %s488_s28 = sshll.u32 %s13_s19, 4 }
  0x13   :  { %s45_s3 = scalar_lea.hbm %s1324_s1, %s488_s28  ;;  %s489_s4 = sshll.u32 %s1037_s22, 4 }
  0x14   :  { %s549_s5 = scalar_lea.hbm %s45_s3, 16  ;;  %p552_p4 = scmp.lt.u32.totalorder %s45_s3, %s1324_s1 }
  0x15   :  { %p550_p3 = scmp.ne.s32.totalorder %s45_s3, %s549_s5  ;;  %p553_p5 = scmp.lt.u32.totalorder %s1056_s8, %s549_s5 }
  0x16   :  { %p555_p7 = scmp.lt.u32.totalorder %s549_s5, %s45_s3 }
  0x17   :  { %p554_p6 = por %p553_p5, %p552_p4 }
  0x19   :  { %p556_p8 = por %p555_p7, %p554_p6 }
  0x1b   :  { %p557_p9 = pnand %p556_p8, %p550_p3 }
  0x1d   :  { %560 = shalt.err (!%p557_p9)  }
  0x1e   :  { %s561_s11 = scalar_lea.vmem %s1039_s21, 16  ;;  %s1065_s12 = scalar_lea.vmem %s1039_s21, 256 }
  0x1f   :  { %p562_p10 = scmp.ne.s32.totalorder %s1039_s21, %s561_s11  ;;  %p566_p11 = scmp.lt.s32.totalorder %s1039_s21, %s1039_s21 }
  0x20   :  { %p567_p12 = scmp.lt.s32.totalorder %s1065_s12, %s561_s11 }
  0x22   :  { %p568_p13 = por %p567_p12, %p566_p11 }
  0x24   :  { %p569_p0 = pnand %p568_p13, %p562_p10 }
  0x26   :  { %572 = shalt.err (!%p569_p0)  }
  0x27   :  { %56 = dma.hbm_to_vmem [thread:$0]  %s45_s3, 16, %s1039_s21, [#allocation2] }
  0x28   :  { %s58_s15 = scalar_lea.hbm %s1324_s1, %s489_s4  ;;  %s490_s16 = sshll.u32 %s1041_s25, 4 }
  0x29   :  { %s573_s17 = scalar_lea.hbm %s58_s15, 16  ;;  %p576_p2 = scmp.lt.u32.totalorder %s58_s15, %s1324_s1 }
  0x2a   :  { %p574_p1 = scmp.ne.s32.totalorder %s58_s15, %s573_s17  ;;  %p577_p3 = scmp.lt.u32.totalorder %s1056_s8, %s573_s17 }
  0x2b   :  { %p579_p5 = scmp.lt.u32.totalorder %s573_s17, %s58_s15 }
  0x2c   :  { %p578_p4 = por %p577_p3, %p576_p2 }
  0x2e   :  { %p580_p6 = por %p579_p5, %p578_p4 }
  0x30   :  { %p581_p7 = pnand %p580_p6, %p574_p1 }
  0x32   :  { %584 = shalt.err (!%p581_p7)  }
  0x33   :  { %s585_s20 = scalar_lea.vmem %s1043_s24, 16  ;;  %p590_p9 = scmp.lt.s32.totalorder %s1043_s24, %s1039_s21 }
  0x34   :  { %p586_p8 = scmp.ne.s32.totalorder %s1043_s24, %s585_s20  ;;  %p591_p10 = scmp.lt.s32.totalorder %s1065_s12, %s585_s20 }
  0x36   :  { %p592_p12 = por %p591_p10, %p590_p9 }
  0x38   :  { %p593_p13 = pnand %p592_p12, %p586_p8 }
  0x3a   :  { %596 = shalt.err (!%p593_p13)  }
  0x3b   :  { %71 = dma.hbm_to_vmem [thread:$0]  %s58_s15, 16, %s1043_s24, [#allocation2 + $0x1] }
  0x3c   :  { %s73_s25 = scalar_lea.hbm %s1324_s1, %s490_s16  ;;  %s491_s26 = sshll.u32 %s1045_s27, 4 }
  0x3d   :  { %s597_s28 = scalar_lea.hbm %s73_s25, 16  ;;  %p600_p1 = scmp.lt.u32.totalorder %s73_s25, %s1324_s1 }
  0x3e   :  { %p598_p0 = scmp.ne.s32.totalorder %s73_s25, %s597_s28  ;;  %p601_p2 = scmp.lt.u32.totalorder %s1056_s8, %s597_s28 }
  0x3f   :  { %p603_p4 = scmp.lt.u32.totalorder %s597_s28, %s73_s25 }
  0x40   :  { %p602_p3 = por %p601_p2, %p600_p1 }
  0x42   :  { %p604_p5 = por %p603_p4, %p602_p3 }
  0x44   :  { %p605_p6 = pnand %p604_p5, %p598_p0 }
  0x46   :  { %608 = shalt.err (!%p605_p6)  }
  0x47   :  { %s609_s24 = scalar_lea.vmem %s1047_s0, 16  ;;  %p614_p8 = scmp.lt.s32.totalorder %s1047_s0, %s1039_s21 }
  0x48   :  { %p610_p7 = scmp.ne.s32.totalorder %s1047_s0, %s609_s24  ;;  %p615_p9 = scmp.lt.s32.totalorder %s1065_s12, %s609_s24 }
  0x4a   :  { %p616_p10 = por %p615_p9, %p614_p8 }
  0x4c   :  { %p617_p12 = pnand %p616_p10, %p610_p7 }
  0x4e   :  { %620 = shalt.err (!%p617_p12)  }
  0x4f   :  { %86 = dma.hbm_to_vmem [thread:$0]  %s73_s25, 16, %s1047_s0, [#allocation2 + $0x2] }
  0x50   :  { %s88_s4 = scalar_lea.hbm %s1324_s1, %s491_s26  ;;  %s995_s5 = smov [#allocation5 + $0x3]  }
  0x51   :  { %s98_s6 = sshll.u32 %s995_s5, 4  ;;  %s1105_s7 = sld [smem:[#allocation4 + $0x4]]  ;;  %s99_s6 = int_to_ptr.vmem [resolvable:$true] %s98_s6 }
  0x52   :  { %s621_s9 = scalar_lea.hbm %s88_s4, 16  ;;  %p624_p0 = scmp.lt.u32.totalorder %s88_s4, %s1324_s1 }
  0x53   :  { %p622_p13 = scmp.ne.s32.totalorder %s88_s4, %s621_s9  ;;  %p625_p1 = scmp.lt.u32.totalorder %s1056_s8, %s621_s9 }
  0x54   :  { %p627_p3 = scmp.lt.u32.totalorder %s621_s9, %s88_s4 }
  0x55   :  { %p626_p2 = por %p625_p1, %p624_p0 }
  0x57   :  { %p628_p4 = por %p627_p3, %p626_p2 }
  0x59   :  { %p629_p5 = pnand %p628_p4, %p622_p13 }
  0x5b   :  { %632 = shalt.err (!%p629_p5)  }
  0x5c   :  { %s633_s0 = scalar_lea.vmem %s99_s6, 16  ;;  %p638_p7 = scmp.lt.s32.totalorder %s99_s6, %s1039_s21 }
  0x5d   :  { %p634_p6 = scmp.ne.s32.totalorder %s99_s6, %s633_s0  ;;  %p639_p8 = scmp.lt.s32.totalorder %s1065_s12, %s633_s0 }
  0x5f   :  { %p640_p9 = por %p639_p8, %p638_p7 }
  0x61   :  { %p641_p10 = pnand %p640_p9, %p634_p6 }
  0x63   :  { %644 = shalt.err (!%p641_p10)  }
  0x64   :  { %101 = dma.hbm_to_vmem [thread:$0]  %s88_s4, 16, %s99_s6, [#allocation2 + $0x3] }
  0x65   :  { %s996_s13 = smov [#allocation5 + $0x4]   ;;  %s1113_s15 = sld [smem:[#allocation4 + $0x5]] }
  0x66   :  { %s113_s14 = sshll.u32 %s996_s13, 4  ;;  %s997_s16 = smov [#allocation5 + $0x5]   ;;  %s114_s14 = int_to_ptr.vmem [resolvable:$true] %s113_s14 }
  0x67   :  { %s128_s17 = sshll.u32 %s997_s16, 4  ;;  %s1115_s18 = sld [smem:[#allocation4 + $0x6]]  ;;  %s1118_s17 = int_to_ptr.vmem [resolvable:$true] %s128_s17 }
  0x68   :  { %s492_s19 = sshll.u32 %s1105_s7, 4 }
  0x69   :  { %s103_s23 = scalar_lea.hbm %s1324_s1, %s492_s19 }
  0x6a   :  { %s645_s25 = scalar_lea.hbm %s103_s23, 16  ;;  %p648_p13 = scmp.lt.u32.totalorder %s103_s23, %s1324_s1 }
  0x6b   :  { %p646_p12 = scmp.ne.s32.totalorder %s103_s23, %s645_s25  ;;  %p649_p0 = scmp.lt.u32.totalorder %s1056_s8, %s645_s25 }
  0x6c   :  { %p651_p2 = scmp.lt.u32.totalorder %s645_s25, %s103_s23 }
  0x6d   :  { %p650_p1 = por %p649_p0, %p648_p13 }
  0x6f   :  { %p652_p3 = por %p651_p2, %p650_p1 }
  0x71   :  { %p653_p4 = pnand %p652_p3, %p646_p12 }
  0x73   :  { %656 = shalt.err (!%p653_p4)  }
  0x74   :  { %s657_s29 = scalar_lea.vmem %s114_s14, 16  ;;  %p662_p6 = scmp.lt.s32.totalorder %s114_s14, %s1039_s21 }
  0x75   :  { %p658_p5 = scmp.ne.s32.totalorder %s114_s14, %s657_s29  ;;  %p663_p7 = scmp.lt.s32.totalorder %s1065_s12, %s657_s29 }
  0x77   :  { %p664_p8 = por %p663_p7, %p662_p6 }
  0x79   :  { %p665_p9 = pnand %p664_p8, %p658_p5 }
  0x7b   :  { %668 = shalt.err (!%p665_p9)  }
  0x7c   :  { %116 = dma.hbm_to_vmem [thread:$0]  %s103_s23, 16, %s114_s14, [#allocation2 + $0x4] }
  0x7d   :  { %s493_s30 = sshll.u32 %s1113_s15, 4  ;;  %s998_s24 = smov [#allocation5 + $0x6]  }
  0x7e   :  { %s143_s27 = sshll.u32 %s998_s24, 4  ;;  %s118_s5 = scalar_lea.hbm %s1324_s1, %s493_s30  ;;  %s1133_s27 = int_to_ptr.vmem [resolvable:$true] %s143_s27 }
  0x7f   :  { %s669_s6 = scalar_lea.hbm %s118_s5, 16  ;;  %p672_p12 = scmp.lt.u32.totalorder %s118_s5, %s1324_s1 }
  0x80   :  { %p670_p10 = scmp.ne.s32.totalorder %s118_s5, %s669_s6  ;;  %p673_p13 = scmp.lt.u32.totalorder %s1056_s8, %s669_s6 }
  0x81   :  { %p675_p1 = scmp.lt.u32.totalorder %s669_s6, %s118_s5 }
  0x82   :  { %p674_p0 = por %p673_p13, %p672_p12 }
  0x84   :  { %p676_p2 = por %p675_p1, %p674_p0 }
  0x86   :  { %p677_p3 = pnand %p676_p2, %p670_p10 }
  0x88   :  { %680 = shalt.err (!%p677_p3)  }
  0x89   :  { %s681_s10 = scalar_lea.vmem %s1118_s17, 16  ;;  %p686_p5 = scmp.lt.s32.totalorder %s1118_s17, %s1039_s21 }
  0x8a   :  { %p682_p4 = scmp.ne.s32.totalorder %s1118_s17, %s681_s10  ;;  %p687_p6 = scmp.lt.s32.totalorder %s1065_s12, %s681_s10 }
  0x8c   :  { %p688_p7 = por %p687_p6, %p686_p5 }
  0x8e   :  { %p689_p8 = pnand %p688_p7, %p682_p4 }
  0x90   :  { %692 = shalt.err (!%p689_p8)  }
  0x91   :  { %131 = dma.hbm_to_vmem [thread:$0]  %s118_s5, 16, %s1118_s17, [#allocation2 + $0x5] }
  0x92   :  { %s494_s11 = sshll.u32 %s1115_s18, 4  ;;  %s1146_s0 = sld [smem:[#allocation4 + $0x7]] }
  0x93   :  { %s133_s15 = scalar_lea.hbm %s1324_s1, %s494_s11 }
  0x94   :  { %s693_s16 = scalar_lea.hbm %s133_s15, 16  ;;  %p696_p10 = scmp.lt.u32.totalorder %s133_s15, %s1324_s1 }
  0x95   :  { %p694_p9 = scmp.ne.s32.totalorder %s133_s15, %s693_s16  ;;  %p697_p12 = scmp.lt.u32.totalorder %s1056_s8, %s693_s16 }
  0x96   :  { %p699_p0 = scmp.lt.u32.totalorder %s693_s16, %s133_s15 }
  0x97   :  { %p698_p13 = por %p697_p12, %p696_p10 }
  0x99   :  { %p700_p1 = por %p699_p0, %p698_p13 }
  0x9b   :  { %p701_p2 = pnand %p700_p1, %p694_p9 }
  0x9d   :  { %704 = shalt.err (!%p701_p2)  }
  0x9e   :  { %s705_s17 = scalar_lea.vmem %s1133_s27, 16  ;;  %p710_p4 = scmp.lt.s32.totalorder %s1133_s27, %s1039_s21 }
  0x9f   :  { %p706_p3 = scmp.ne.s32.totalorder %s1133_s27, %s705_s17  ;;  %p711_p5 = scmp.lt.s32.totalorder %s1065_s12, %s705_s17 }
  0xa1   :  { %p712_p6 = por %p711_p5, %p710_p4 }
  0xa3   :  { %p713_p7 = pnand %p712_p6, %p706_p3 }
  0xa5   :  { %716 = shalt.err (!%p713_p7)  }
  0xa6   :  { %146 = dma.hbm_to_vmem [thread:$0]  %s133_s15, 16, %s1133_s27, [#allocation2 + $0x6] }
  0xa7   :  { %s999_s18 = smov [#allocation5 + $0x7]   ;;  %s1161_s23 = sld [smem:[#allocation4 + $0x8]] }
  0xa8   :  { %s158_s22 = sshll.u32 %s999_s18, 4  ;;  %s1000_s25 = smov [#allocation5 + $0x8]   ;;  %s159_s22 = int_to_ptr.vmem [resolvable:$true] %s158_s22 }
  0xa9   :  { %s173_s26 = sshll.u32 %s1000_s25, 4  ;;  %s1163_s28 = sld [smem:[#allocation4 + $0x9]]  ;;  %s1166_s26 = int_to_ptr.vmem [resolvable:$true] %s173_s26 }
  0xaa   :  { %s495_s29 = sshll.u32 %s1146_s0, 4 }
  0xab   :  { %s148_s3 = scalar_lea.hbm %s1324_s1, %s495_s29 }
  0xac   :  { %s717_s4 = scalar_lea.hbm %s148_s3, 16  ;;  %p720_p9 = scmp.lt.u32.totalorder %s148_s3, %s1324_s1 }
  0xad   :  { %p718_p8 = scmp.ne.s32.totalorder %s148_s3, %s717_s4  ;;  %p721_p10 = scmp.lt.u32.totalorder %s1056_s8, %s717_s4 }
  0xae   :  { %p723_p13 = scmp.lt.u32.totalorder %s717_s4, %s148_s3 }
  0xaf   :  { %p722_p12 = por %p721_p10, %p720_p9 }
  0xb1   :  { %p724_p0 = por %p723_p13, %p722_p12 }
  0xb3   :  { %p725_p1 = pnand %p724_p0, %p718_p8 }
  0xb5   :  { %728 = shalt.err (!%p725_p1)  }
  0xb6   :  { %s729_s6 = scalar_lea.vmem %s159_s22, 16  ;;  %p734_p3 = scmp.lt.s32.totalorder %s159_s22, %s1039_s21 }
  0xb7   :  { %p730_p2 = scmp.ne.s32.totalorder %s159_s22, %s729_s6  ;;  %p735_p4 = scmp.lt.s32.totalorder %s1065_s12, %s729_s6 }
  0xb9   :  { %p736_p5 = por %p735_p4, %p734_p3 }
  0xbb   :  { %p737_p6 = pnand %p736_p5, %p730_p2 }
  0xbd   :  { %740 = shalt.err (!%p737_p6)  }
  0xbe   :  { %161 = dma.hbm_to_vmem [thread:$0]  %s148_s3, 16, %s159_s22, [#allocation2 + $0x7] }
  0xbf   :  { %s496_s7 = sshll.u32 %s1161_s23, 4  ;;  %s1001_s9 = smov [#allocation5 + $0x9]  }
  0xc0   :  { %s188_s10 = sshll.u32 %s1001_s9, 4  ;;  %s163_s13 = scalar_lea.hbm %s1324_s1, %s496_s7  ;;  %s1181_s10 = int_to_ptr.vmem [resolvable:$true] %s188_s10 }
  0xc1   :  { %s741_s14 = scalar_lea.hbm %s163_s13, 16  ;;  %p744_p8 = scmp.lt.u32.totalorder %s163_s13, %s1324_s1 }
  0xc2   :  { %p742_p7 = scmp.ne.s32.totalorder %s163_s13, %s741_s14  ;;  %p745_p9 = scmp.lt.u32.totalorder %s1056_s8, %s741_s14 }
  0xc3   :  { %p747_p12 = scmp.lt.u32.totalorder %s741_s14, %s163_s13 }
  0xc4   :  { %p746_p10 = por %p745_p9, %p744_p8 }
  0xc6   :  { %p748_p13 = por %p747_p12, %p746_p10 }
  0xc8   :  { %p749_p0 = pnand %p748_p13, %p742_p7 }
  0xca   :  { %752 = shalt.err (!%p749_p0)  }
  0xcb   :  { %s753_s19 = scalar_lea.vmem %s1166_s26, 16  ;;  %p758_p2 = scmp.lt.s32.totalorder %s1166_s26, %s1039_s21 }
  0xcc   :  { %p754_p1 = scmp.ne.s32.totalorder %s1166_s26, %s753_s19  ;;  %p759_p3 = scmp.lt.s32.totalorder %s1065_s12, %s753_s19 }
  0xce   :  { %p760_p4 = por %p759_p3, %p758_p2 }
  0xd0   :  { %p761_p5 = pnand %p760_p4, %p754_p1 }
  0xd2   :  { %764 = shalt.err (!%p761_p5)  }
  0xd3   :  { %176 = dma.hbm_to_vmem [thread:$0]  %s163_s13, 16, %s1166_s26, [#allocation2 + $0x8] }
  0xd4   :  { %s497_s20 = sshll.u32 %s1163_s28, 4  ;;  %s1194_s17 = sld [smem:[#allocation4 + $0xa]] }
  0xd5   :  { %s178_s23 = scalar_lea.hbm %s1324_s1, %s497_s20 }
  0xd6   :  { %s765_s25 = scalar_lea.hbm %s178_s23, 16  ;;  %p768_p7 = scmp.lt.u32.totalorder %s178_s23, %s1324_s1 }
  0xd7   :  { %p766_p6 = scmp.ne.s32.totalorder %s178_s23, %s765_s25  ;;  %p769_p8 = scmp.lt.u32.totalorder %s1056_s8, %s765_s25 }
  0xd8   :  { %p771_p10 = scmp.lt.u32.totalorder %s765_s25, %s178_s23 }
  0xd9   :  { %p770_p9 = por %p769_p8, %p768_p7 }
  0xdb   :  { %p772_p12 = por %p771_p10, %p770_p9 }
  0xdd   :  { %p773_p13 = pnand %p772_p12, %p766_p6 }
  0xdf   :  { %776 = shalt.err (!%p773_p13)  }
  0xe0   :  { %s777_s26 = scalar_lea.vmem %s1181_s10, 16  ;;  %p782_p1 = scmp.lt.s32.totalorder %s1181_s10, %s1039_s21 }
  0xe1   :  { %p778_p0 = scmp.ne.s32.totalorder %s1181_s10, %s777_s26  ;;  %p783_p2 = scmp.lt.s32.totalorder %s1065_s12, %s777_s26 }
  0xe3   :  { %p784_p3 = por %p783_p2, %p782_p1 }
  0xe5   :  { %p785_p4 = pnand %p784_p3, %p778_p0 }
  0xe7   :  { %788 = shalt.err (!%p785_p4)  }
  0xe8   :  { %191 = dma.hbm_to_vmem [thread:$0]  %s178_s23, 16, %s1181_s10, [#allocation2 + $0x9] }
  0xe9   :  { %s1002_s28 = smov [#allocation5 + $0xa]   ;;  %s1209_s3 = sld [smem:[#allocation4 + $0xb]] }
  0xea   :  { %s203_s24 = sshll.u32 %s1002_s28, 4  ;;  %s1003_s4 = smov [#allocation5 + $0xb]   ;;  %s204_s24 = int_to_ptr.vmem [resolvable:$true] %s203_s24 }
  0xeb   :  { %s218_s5 = sshll.u32 %s1003_s4, 4  ;;  %s1211_s27 = sld [smem:[#allocation4 + $0xc]]  ;;  %s1214_s5 = int_to_ptr.vmem [resolvable:$true] %s218_s5 }
  0xec   :  { %s498_s6 = sshll.u32 %s1194_s17, 4 }
  0xed   :  { %s193_s11 = scalar_lea.hbm %s1324_s1, %s498_s6 }
  0xee   :  { %s789_s0 = scalar_lea.hbm %s193_s11, 16  ;;  %p792_p6 = scmp.lt.u32.totalorder %s193_s11, %s1324_s1 }
  0xef   :  { %p790_p5 = scmp.ne.s32.totalorder %s193_s11, %s789_s0  ;;  %p793_p7 = scmp.lt.u32.totalorder %s1056_s8, %s789_s0 }
  0xf0   :  { %p795_p9 = scmp.lt.u32.totalorder %s789_s0, %s193_s11 }
  0xf1   :  { %p794_p8 = por %p793_p7, %p792_p6 }
  0xf3   :  { %p796_p10 = por %p795_p9, %p794_p8 }
  0xf5   :  { %p797_p12 = pnand %p796_p10, %p790_p5 }
  0xf7   :  { %800 = shalt.err (!%p797_p12)  }
  0xf8   :  { %s801_s14 = scalar_lea.vmem %s204_s24, 16  ;;  %p806_p0 = scmp.lt.s32.totalorder %s204_s24, %s1039_s21 }
  0xf9   :  { %p802_p13 = scmp.ne.s32.totalorder %s204_s24, %s801_s14  ;;  %p807_p1 = scmp.lt.s32.totalorder %s1065_s12, %s801_s14 }
  0xfb   :  { %p808_p2 = por %p807_p1, %p806_p0 }
  0xfd   :  { %p809_p3 = pnand %p808_p2, %p802_p13 }
  0xff   :  { %812 = shalt.err (!%p809_p3)  }
 0x100   :  { %206 = dma.hbm_to_vmem [thread:$0]  %s193_s11, 16, %s204_s24, [#allocation2 + $0xa] }
 0x101   :  { %s499_s15 = sshll.u32 %s1209_s3, 4  ;;  %s1004_s16 = smov [#allocation5 + $0xc]  }
 0x102   :  { %s233_s19 = sshll.u32 %s1004_s16, 4  ;;  %s208_s18 = scalar_lea.hbm %s1324_s1, %s499_s15  ;;  %s1229_s19 = int_to_ptr.vmem [resolvable:$true] %s233_s19 }
 0x103   :  { %s813_s22 = scalar_lea.hbm %s208_s18, 16  ;;  %p816_p5 = scmp.lt.u32.totalorder %s208_s18, %s1324_s1 }
 0x104   :  { %p814_p4 = scmp.ne.s32.totalorder %s208_s18, %s813_s22  ;;  %p817_p6 = scmp.lt.u32.totalorder %s1056_s8, %s813_s22 }
 0x105   :  { %p819_p8 = scmp.lt.u32.totalorder %s813_s22, %s208_s18 }
 0x106   :  { %p818_p7 = por %p817_p6, %p816_p5 }
 0x108   :  { %p820_p9 = por %p819_p8, %p818_p7 }
 0x10a   :  { %p821_p10 = pnand %p820_p9, %p814_p4 }
 0x10c   :  { %824 = shalt.err (!%p821_p10)  }
 0x10d   :  { %s825_s29 = scalar_lea.vmem %s1214_s5, 16  ;;  %p830_p13 = scmp.lt.s32.totalorder %s1214_s5, %s1039_s21 }
 0x10e   :  { %p826_p12 = scmp.ne.s32.totalorder %s1214_s5, %s825_s29  ;;  %p831_p0 = scmp.lt.s32.totalorder %s1065_s12, %s825_s29 }
 0x110   :  { %p832_p1 = por %p831_p0, %p830_p13 }
 0x112   :  { %p833_p2 = pnand %p832_p1, %p826_p12 }
 0x114   :  { %836 = shalt.err (!%p833_p2)  }
 0x115   :  { %221 = dma.hbm_to_vmem [thread:$0]  %s208_s18, 16, %s1214_s5, [#allocation2 + $0xb] }
 0x116   :  { %s500_s30 = sshll.u32 %s1211_s27, 4  ;;  %s1242_s26 = sld [smem:[#allocation4 + $0xd]] }
 0x117   :  { %s223_s3 = scalar_lea.hbm %s1324_s1, %s500_s30 }
 0x118   :  { %s837_s4 = scalar_lea.hbm %s223_s3, 16  ;;  %p840_p4 = scmp.lt.u32.totalorder %s223_s3, %s1324_s1 }
 0x119   :  { %p838_p3 = scmp.ne.s32.totalorder %s223_s3, %s837_s4  ;;  %p841_p5 = scmp.lt.u32.totalorder %s1056_s8, %s837_s4 }
 0x11a   :  { %p843_p7 = scmp.lt.u32.totalorder %s837_s4, %s223_s3 }
 0x11b   :  { %p842_p6 = por %p841_p5, %p840_p4 }
 0x11d   :  { %p844_p8 = por %p843_p7, %p842_p6 }
 0x11f   :  { %p845_p9 = pnand %p844_p8, %p838_p3 }
 0x121   :  { %848 = shalt.err (!%p845_p9)  }
 0x122   :  { %s849_s5 = scalar_lea.vmem %s1229_s19, 16  ;;  %p854_p12 = scmp.lt.s32.totalorder %s1229_s19, %s1039_s21 }
 0x123   :  { %p850_p10 = scmp.ne.s32.totalorder %s1229_s19, %s849_s5  ;;  %p855_p13 = scmp.lt.s32.totalorder %s1065_s12, %s849_s5 }
 0x125   :  { %p856_p0 = por %p855_p13, %p854_p12 }
 0x127   :  { %p857_p1 = pnand %p856_p0, %p850_p10 }
 0x129   :  { %860 = shalt.err (!%p857_p1)  }
 0x12a   :  { %236 = dma.hbm_to_vmem [thread:$0]  %s223_s3, 16, %s1229_s19, [#allocation2 + $0xc] }
 0x12b   :  { %s1005_s27 = smov [#allocation5 + $0xd]   ;;  %s1257_s11 = sld [smem:[#allocation4 + $0xe]] }
 0x12c   :  { %s248_s9 = sshll.u32 %s1005_s27, 4  ;;  %s1006_s0 = smov [#allocation5 + $0xe]   ;;  %s249_s9 = int_to_ptr.vmem [resolvable:$true] %s248_s9 }
 0x12d   :  { %s263_s13 = sshll.u32 %s1006_s0, 4  ;;  %s1259_s10 = sld [smem:[#allocation4 + $0xf]]  ;;  %s1262_s13 = int_to_ptr.vmem [resolvable:$true] %s263_s13 }
 0x12e   :  { %s501_s14 = sshll.u32 %s1242_s26, 4 }
 0x12f   :  { %s238_s20 = scalar_lea.hbm %s1324_s1, %s501_s14 }
 0x130   :  { %s861_s17 = scalar_lea.hbm %s238_s20, 16  ;;  %p864_p3 = scmp.lt.u32.totalorder %s238_s20, %s1324_s1 }
 0x131   :  { %p862_p2 = scmp.ne.s32.totalorder %s238_s20, %s861_s17  ;;  %p865_p4 = scmp.lt.u32.totalorder %s1056_s8, %s861_s17 }
 0x132   :  { %p867_p6 = scmp.lt.u32.totalorder %s861_s17, %s238_s20 }
 0x133   :  { %p866_p5 = por %p865_p4, %p864_p3 }
 0x135   :  { %p868_p7 = por %p867_p6, %p866_p5 }
 0x137   :  { %p869_p8 = pnand %p868_p7, %p862_p2 }
 0x139   :  { %872 = shalt.err (!%p869_p8)  }
 0x13a   :  { %s873_s22 = scalar_lea.vmem %s249_s9, 16  ;;  %p878_p10 = scmp.lt.s32.totalorder %s249_s9, %s1039_s21 }
 0x13b   :  { %p874_p9 = scmp.ne.s32.totalorder %s249_s9, %s873_s22  ;;  %p879_p12 = scmp.lt.s32.totalorder %s1065_s12, %s873_s22 }
 0x13d   :  { %p880_p13 = por %p879_p12, %p878_p10 }
 0x13f   :  { %p881_p0 = pnand %p880_p13, %p874_p9 }
 0x141   :  { %884 = shalt.err (!%p881_p0)  }
 0x142   :  { %251 = dma.hbm_to_vmem [thread:$0]  %s238_s20, 16, %s249_s9, [#allocation2 + $0xd] }
 0x143   :  { %s502_s23 = sshll.u32 %s1257_s11, 4  ;;  %s1007_s25 = smov [#allocation5 + $0xf]  }
 0x144   :  { %s278_s29 = sshll.u32 %s1007_s25, 4  ;;  %s253_s28 = scalar_lea.hbm %s1324_s1, %s502_s23  ;;  %s1277_s29 = int_to_ptr.vmem [resolvable:$true] %s278_s29 }
 0x145   :  { %s885_s24 = scalar_lea.hbm %s253_s28, 16  ;;  %p888_p2 = scmp.lt.u32.totalorder %s253_s28, %s1324_s1 }
 0x146   :  { %p886_p1 = scmp.ne.s32.totalorder %s253_s28, %s885_s24  ;;  %p889_p3 = scmp.lt.u32.totalorder %s1056_s8, %s885_s24 }
 0x147   :  { %p891_p5 = scmp.lt.u32.totalorder %s885_s24, %s253_s28 }
 0x148   :  { %p890_p4 = por %p889_p3, %p888_p2 }
 0x14a   :  { %p892_p6 = por %p891_p5, %p890_p4 }
 0x14c   :  { %p893_p7 = pnand %p892_p6, %p886_p1 }
 0x14e   :  { %896 = shalt.err (!%p893_p7)  }
 0x14f   :  { %s897_s6 = scalar_lea.vmem %s1262_s13, 16  ;;  %p902_p9 = scmp.lt.s32.totalorder %s1262_s13, %s1039_s21 }
 0x150   :  { %p898_p8 = scmp.ne.s32.totalorder %s1262_s13, %s897_s6  ;;  %p903_p10 = scmp.lt.s32.totalorder %s1065_s12, %s897_s6 }
 0x152   :  { %p904_p12 = por %p903_p10, %p902_p9 }
 0x154   :  { %p905_p13 = pnand %p904_p12, %p898_p8 }
 0x156   :  { %908 = shalt.err (!%p905_p13)  }
 0x157   :  { %266 = dma.hbm_to_vmem [thread:$0]  %s253_s28, 16, %s1262_s13, [#allocation2 + $0xe] }
 0x158   :  { %s503_s7 = sshll.u32 %s1259_s10, 4 }
 0x159   :  { %s268_s9 = scalar_lea.hbm %s1324_s1, %s503_s7 }
 0x15a   :  { %s909_s11 = scalar_lea.hbm %s268_s9, 16  ;;  %p912_p1 = scmp.lt.u32.totalorder %s268_s9, %s1324_s1 }
 0x15b   :  { %p910_p0 = scmp.ne.s32.totalorder %s268_s9, %s909_s11  ;;  %p913_p2 = scmp.lt.u32.totalorder %s1056_s8, %s909_s11 }
 0x15c   :  { %p915_p4 = scmp.lt.u32.totalorder %s909_s11, %s268_s9 }
 0x15d   :  { %p914_p3 = por %p913_p2, %p912_p1 }
 0x15f   :  { %p916_p5 = por %p915_p4, %p914_p3 }
 0x161   :  { %p917_p6 = pnand %p916_p5, %p910_p0 }
 0x163   :  { %920 = shalt.err (!%p917_p6)  }
 0x164   :  { %s921_s13 = scalar_lea.vmem %s1277_s29, 16  ;;  %p926_p8 = scmp.lt.s32.totalorder %s1277_s29, %s1039_s21 }
 0x165   :  { %p922_p7 = scmp.ne.s32.totalorder %s1277_s29, %s921_s13  ;;  %p927_p9 = scmp.lt.s32.totalorder %s1065_s12, %s921_s13 }
 0x167   :  { %p928_p10 = por %p927_p9, %p926_p8 }
 0x169   :  { %p929_p12 = pnand %p928_p10, %p922_p7 }
 0x16b   :  { %932 = shalt.err (!%p929_p12)  }
 0x16c   :  { %281 = dma.hbm_to_vmem [thread:$0]  %s268_s9, 16, %s1277_s29, [#allocation2 + $0xf] }
 0x16d   :  { %957 = dma.done.wait [#allocation2], 16 }
 0x16e   :  { %958 = vsyncadd [#allocation2], 4294967280 }
 0x16f   :  { %959 = dma.done.wait [#allocation2 + $0x1], 16 }
 0x170   :  { %960 = vsyncadd [#allocation2 + $0x1], 4294967280 }
 0x171   :  { %961 = dma.done.wait [#allocation2 + $0x2], 16 }
 0x172   :  { %962 = vsyncadd [#allocation2 + $0x2], 4294967280 }
 0x173   :  { %963 = dma.done.wait [#allocation2 + $0x3], 16 }
 0x174   :  { %964 = vsyncadd [#allocation2 + $0x3], 4294967280 }
 0x175   :  { %965 = dma.done.wait [#allocation2 + $0x4], 16 }
 0x176   :  { %966 = vsyncadd [#allocation2 + $0x4], 4294967280 }
 0x177   :  { %967 = dma.done.wait [#allocation2 + $0x5], 16 }
 0x178   :  { %968 = vsyncadd [#allocation2 + $0x5], 4294967280 }
 0x179   :  { %969 = dma.done.wait [#allocation2 + $0x6], 16 }
 0x17a   :  { %970 = vsyncadd [#allocation2 + $0x6], 4294967280 }
 0x17b   :  { %971 = dma.done.wait [#allocation2 + $0x7], 16 }
 0x17c   :  { %972 = vsyncadd [#allocation2 + $0x7], 4294967280 }
 0x17d   :  { %973 = dma.done.wait [#allocation2 + $0x8], 16 }
 0x17e   :  { %974 = vsyncadd [#allocation2 + $0x8], 4294967280 }
 0x17f   :  { %975 = dma.done.wait [#allocation2 + $0x9], 16 }
 0x180   :  { %976 = vsyncadd [#allocation2 + $0x9], 4294967280 }
 0x181   :  { %977 = dma.done.wait [#allocation2 + $0xa], 16 }
 0x182   :  { %978 = vsyncadd [#allocation2 + $0xa], 4294967280 }
 0x183   :  { %979 = dma.done.wait [#allocation2 + $0xb], 16 }
 0x184   :  { %980 = vsyncadd [#allocation2 + $0xb], 4294967280 }
 0x185   :  { %981 = dma.done.wait [#allocation2 + $0xc], 16 }
 0x186   :  { %982 = vsyncadd [#allocation2 + $0xc], 4294967280 }
 0x187   :  { %983 = dma.done.wait [#allocation2 + $0xd], 16 }
 0x188   :  { %984 = vsyncadd [#allocation2 + $0xd], 4294967280 }
 0x189   :  { %985 = dma.done.wait [#allocation2 + $0xe], 16 }
 0x18a   :  { %986 = vsyncadd [#allocation2 + $0xe], 4294967280 }
 0x18b   :  { %987 = dma.done.wait [#allocation2 + $0xf], 16 }
 0x18c   :  { %988 = vsyncadd [#allocation2 + $0xf], 4294967280  ;;  %p934_p13 = scmp.ne.s32.totalorder %s1039_s21, %s1065_s12  ;;  %p939_p0 = scmp.lt.s32.totalorder %s1065_s12, %s1065_s12 }
 0x18e   :  { %p940_p1 = por %p939_p0, %p566_p11 }
 0x190   :  { %p941_p2 = pnand %p940_p1, %p934_p13 }
 0x192   :  { %944 = shalt.err (!%p941_p2)
}
 0x193   :  { %s945_s10 = scalar_lea.hbm %s1325_s2, 256 }
 0x194   :  { %p946_p3 = scmp.ne.s32.totalorder %s1325_s2, %s945_s10  ;;  %p949_p4 = scmp.lt.u32.totalorder %s945_s10, %s1325_s2 }
 0x196   :  { %p951_p5 = pnand %p949_p4, %p946_p3 }
 0x198   :  { %954 = shalt.err (!%p951_p5)
}
 0x199   :  { %s1008_s18 = smov 128   ;;  %s1009_s12 = smov 8  }
 0x19a   :  { %325 = dma.vmem_to_hbm [thread:$0]  %s1039_s21, 256, %s1325_s2, [#allocation6], %s1008_s18, %s1008_s18, %s1009_s12  }
 0x19b   :  { %989 = dma.done.wait [#allocation6], 256  }
 0x19c   :  { %990 = vsyncadd [#allocation6], 4294967040 }
 0x19d   :  { %329 = vsyncpa [#allocation6], 1 }
 0x19e   :  { %330 = vsyncmov [#allocation2] }
 0x1a1   :  { %s331_s23 = vpop.sfrf %330 }
 0x1a2   :  { %p504_p11 = scmp.ne.s32.totalorder %s331_s23, 0 }
 0x1a4   :  { %335 = shalt.err (%p504_p11)  }
 0x1a5   :  { %337 = vsyncmov [#allocation2 + $0x1] }
 0x1a8   :  { %s338_s25 = vpop.sfrf %337 }
 0x1a9   :  { %p505_p6 = scmp.ne.s32.totalorder %s338_s25, 0 }
 0x1ab   :  { %342 = shalt.err (%p505_p6)  }
 0x1ac   :  { %344 = vsyncmov [#allocation2 + $0x2] }
 0x1af   :  { %s345_s29 = vpop.sfrf %344 }
 0x1b0   :  { %p506_p7 = scmp.ne.s32.totalorder %s345_s29, 0 }
 0x1b2   :  { %349 = shalt.err (%p506_p7)  }
 0x1b3   :  { %351 = vsyncmov [#allocation2 + $0x3] }
 0x1b6   :  { %s352_s30 = vpop.sfrf %351 }
 0x1b7   :  { %p507_p8 = scmp.ne.s32.totalorder %s352_s30, 0 }
 0x1b9   :  { %356 = shalt.err (%p507_p8)  }
 0x1ba   :  { %358 = vsyncmov [#allocation2 + $0x4] }
 0x1bd   :  { %s359_s2 = vpop.sfrf %358 }
 0x1be   :  { %p508_p9 = scmp.ne.s32.totalorder %s359_s2, 0 }
 0x1c0   :  { %363 = shalt.err (%p508_p9)  }
 0x1c1   :  { %365 = vsyncmov [#allocation2 + $0x5] }
 0x1c4   :  { %s366_s21 = vpop.sfrf %365 }
 0x1c5   :  { %p509_p10 = scmp.ne.s32.totalorder %s366_s21, 0 }
 0x1c7   :  { %370 = shalt.err (%p509_p10)  }
 0x1c8   :  { %372 = vsyncmov [#allocation2 + $0x6] }
 0x1cb   :  { %s373_s26 = vpop.sfrf %372 }
 0x1cc   :  { %p510_p12 = scmp.ne.s32.totalorder %s373_s26, 0 }
 0x1ce   :  { %377 = shalt.err (%p510_p12)  }
 0x1cf   :  { %379 = vsyncmov [#allocation2 + $0x7] }
 0x1d2   :  { %s380_s28 = vpop.sfrf %379 }
 0x1d3   :  { %p511_p13 = scmp.ne.s32.totalorder %s380_s28, 0 }
 0x1d5   :  { %384 = shalt.err (%p511_p13)  }
 0x1d6   :  { %386 = vsyncmov [#allocation2 + $0x8] }
 0x1d9   :  { %s387_s24 = vpop.sfrf %386 }
 0x1da   :  { %p512_p0 = scmp.ne.s32.totalorder %s387_s24, 0 }
 0x1dc   :  { %391 = shalt.err (%p512_p0)  }
 0x1dd   :  { %393 = vsyncmov [#allocation2 + $0x9] }
 0x1e0   :  { %s394_s3 = vpop.sfrf %393 }
 0x1e1   :  { %p513_p1 = scmp.ne.s32.totalorder %s394_s3, 0 }
 0x1e3   :  { %398 = shalt.err (%p513_p1)  }
 0x1e4   :  { %400 = vsyncmov [#allocation2 + $0xa] }
 0x1e7   :  { %s401_s4 = vpop.sfrf %400 }
 0x1e8   :  { %p514_p2 = scmp.ne.s32.totalorder %s401_s4, 0 }
 0x1ea   :  { %405 = shalt.err (%p514_p2)  }
 0x1eb   :  { %407 = vsyncmov [#allocation2 + $0xb] }
 0x1ee   :  { %s408_s6 = vpop.sfrf %407 }
 0x1ef   :  { %p515_p3 = scmp.ne.s32.totalorder %s408_s6, 0 }
 0x1f1   :  { %412 = shalt.err (%p515_p3)  }
 0x1f2   :  { %414 = vsyncmov [#allocation2 + $0xc] }
 0x1f5   :  { %s415_s7 = vpop.sfrf %414 }
 0x1f6   :  { %p516_p4 = scmp.ne.s32.totalorder %s415_s7, 0 }
 0x1f8   :  { %419 = shalt.err (%p516_p4)  }
 0x1f9   :  { %421 = vsyncmov [#allocation2 + $0xd] }
 0x1fc   :  { %s422_s5 = vpop.sfrf %421 }
 0x1fd   :  { %p517_p5 = scmp.ne.s32.totalorder %s422_s5, 0 }
 0x1ff   :  { %426 = shalt.err (%p517_p5)  }
 0x200   :  { %428 = vsyncmov [#allocation2 + $0xe] }
 0x203   :  { %s429_s27 = vpop.sfrf %428 }
 0x204   :  { %p518_p11 = scmp.ne.s32.totalorder %s429_s27, 0 }
 0x206   :  { %433 = shalt.err (%p518_p11)  }
 0x207   :  { %435 = vsyncmov [#allocation2 + $0xf] }
 0x20a   :  { %s436_s9 = vpop.sfrf %435 }
 0x20b   :  { %p519_p6 = scmp.ne.s32.totalorder %s436_s9, 0 }
 0x20d   :  { %440 = shalt.err (%p519_p6)  }

</bundles_post_ra>
